<compile_context>
chip_gen: v6e
topology: v6e:2x2x1
jax: 0.10.0
libtpu: 0.0.40
codegen_flags: <defaults>
</compile_context>

<pallas_src>
import jax
import jax.numpy as jnp
from jax.experimental import pallas as pl
from jax.experimental.pallas import tpu as pltpu

KERNEL_SIZE = 3
N_LAYERS = 5
N_NETS = 2


def _parent_net_kernel(x_ref, dw_ref, db_ref, pw_ref, pb_ref, o_ref):
    """Single-invocation kernel: whole batch + both child nets fused on lanes.

    x_ref : (T, B*C)         input activations, lane order (b, c)
    dw_ref: (L, K, G*C)      depthwise weights, lane order (net, b, c), G = N_NETS*B
    db_ref: (L, 1, G*C)      depthwise bias
    pw_ref: (L, G*C, G*C)    block-diagonal pointwise (1x1 conv) weights
    pb_ref: (L, 1, G*C)      pointwise bias
    o_ref : (T, B*C)         child_net(x) + child_net2(x)
    """
    T, BC = x_ref.shape
    GC = pw_ref.shape[-1]

    x_in = x_ref[...].astype(jnp.float32)                 # (T, B*C)
    # Replicate the input for both nets along lanes -> (T, G*C): fully
    # lane-dense (128 lanes for B=2, C=32).
    x = jnp.concatenate([x_in, x_in], axis=1)

    # Time index along sublanes, used to zero the causal prefix of rolled reads.
    t_idx = jax.lax.broadcasted_iota(jnp.int32, (T, GC), 0)

    for layer in range(N_LAYERS):
        d = 2 ** layer
        # Static per-layer Ref slices (cheap; keeps vreg pressure flat).
        dw_l = dw_ref[layer]                               # (K, G*C)
        db_l = db_ref[layer]                               # (1, G*C)
        pw_l = pw_ref[layer]                               # (G*C, G*C)
        pb_l = pb_ref[layer]                               # (1, G*C)

        # Causal dilated depthwise conv:
        #   y[t, l] = db[l] + sum_k dw[k, l] * x[t - (K-1-k)*d, l]   (x[<0] == 0)
        # shift == 0 tap comes straight from x; other taps are register-resident
        # sublane rolls + iota mask (no VMEM staging / store->load round trip).
        y = x * dw_l[KERNEL_SIZE - 1:KERNEL_SIZE, :] + db_l
        for k in range(KERNEL_SIZE - 1):
            shift = (KERNEL_SIZE - 1 - k) * d
            if shift >= T:
                continue                                    # tap sees only causal zeros
            xs = pltpu.roll(x, shift, axis=0)               # xs[t] = x[(t - shift) % T]
            xs = jnp.where(t_idx >= shift, xs, 0.0)         # zero the wrapped prefix
            y = y + xs * dw_l[k:k + 1, :]
        y = jax.nn.gelu(y, approximate=True)

        # Pointwise 1x1 conv of both nets / all batch elements as ONE MXU matmul
        # against the block-diagonal weight (M=T, K=N=G*C=128).
        # (bf16 operand cast would give 2x MXU throughput on v6e/v7x; kept f32
        #  to preserve the f32 PyTorch semantics.)
        y = jax.lax.dot_general(
            y, pw_l, (((1,), (1,)), ((), ())),
            preferred_element_type=jnp.float32,
        )
        y = y + pb_l
        y = jax.nn.gelu(y, approximate=True)

        x = x + y                                           # residual

    # ParentNet: child_net(x) + child_net2(x)  (net0 = lanes [0, BC), net1 = rest)
    o_ref[...] = (x[:, :BC] + x[:, BC:]).astype(o_ref.dtype)


def _fuse_params(params, batch_size):
    """Pack per-net weights into the fused lane layout (net, batch, channel)."""
    dww, dwb, pww, pwb = params
    C = dww.shape[-1]
    B = batch_size
    G = N_NETS * B

    # depthwise weights: (net, L, K, C) -> (L, K, net, C) -> repeat over batch
    dw_f = jnp.repeat(jnp.transpose(dww, (1, 2, 0, 3)), B, axis=2)
    dw_f = dw_f.reshape(N_LAYERS, KERNEL_SIZE, G * C).astype(jnp.float32)

    db_f = jnp.repeat(jnp.transpose(dwb, (1, 0, 2)), B, axis=1)
    db_f = db_f.reshape(N_LAYERS, 1, G * C).astype(jnp.float32)

    pb_f = jnp.repeat(jnp.transpose(pwb, (1, 0, 2)), B, axis=1)
    pb_f = pb_f.reshape(N_LAYERS, 1, G * C).astype(jnp.float32)

    # pointwise weights: block-diagonal over the G = N_NETS*B groups
    wg = jnp.repeat(jnp.transpose(pww, (1, 0, 2, 3)), B, axis=1)        # (L, G, C, C)
    pw_f = jnp.einsum("lgij,gh->lgihj", wg, jnp.eye(G, dtype=wg.dtype))
    pw_f = pw_f.reshape(N_LAYERS, G * C, G * C).astype(jnp.float32)
    return dw_f, db_f, pw_f, pb_f


def parent_net_forward(caches, x_nct, params):
    """Mirrors ParentNet.forward(caches, x): returns (child1(x) + child2(x), [])."""
    del caches  # forward() stores but never consumes caches (no hooks active)
    B, C, T = x_nct.shape
    dw_f, db_f, pw_f, pb_f = _fuse_params(params, B)

    # (B, C, T) -> (T, B*C): time on sublanes, batch*channels on lanes.
    # TODO(synk): at production scale keep the model in (T, B*C)/(B, T, C)
    # end-to-end (or relayout on the VMEM tile) to avoid this HBM transpose.
    x_flat = jnp.transpose(x_nct, (2, 0, 1)).reshape(T, B * C)

    out_flat = pl.pallas_call(
        _parent_net_kernel,
        out_shape=jax.ShapeDtypeStruct((T, B * C), x_nct.dtype),
    )(x_flat, dw_f, db_f, pw_f, pb_f)

    out_nct = jnp.transpose(out_flat.reshape(T, B, C), (1, 2, 0))
    return out_nct, []


def _reference_forward(x_nct, params):
    """Pure-JAX reference with identical math (for correctness checking)."""
    dww, dwb, pww, pwb = params
    B, C, T = x_nct.shape
    x_btc = jnp.transpose(x_nct, (0, 2, 1)).astype(jnp.float32)
    acc = jnp.zeros_like(x_btc)
    for net in range(N_NETS):
        x = x_btc
        for layer in range(N_LAYERS):
            d = 2 ** layer
            pad = (KERNEL_SIZE - 1) * d
            xp = jnp.pad(x, ((0, 0), (pad, 0), (0, 0)))
            y = jnp.zeros_like(x)
            for k in range(KERNEL_SIZE):
                y = y + xp[:, k * d:k * d + T, :] * dww[net, layer, k][None, None, :]
            y = y + dwb[net, layer]
            y = jax.nn.gelu(y, approximate=True)
            y = jnp.einsum("btc,oc->bto", y, pww[net, layer])
            y = y + pwb[net, layer]
            y = jax.nn.gelu(y, approximate=True)
            x = x + y
        acc = acc + x
    return jnp.transpose(acc, (0, 2, 1))


if __name__ == "__main__":
    # small shapes: batch=2, channels(out_channels=input_size)=32, time=16
    B, C, T = 2, 32, 16
    key = jax.random.PRNGKey(0)
    k0, k1, k2, k3, k4 = jax.random.split(key, 5)

    x = jax.random.normal(k0, (B, C, T), jnp.float32)
    dww = 0.1 * jax.random.normal(k1, (N_NETS, N_LAYERS, KERNEL_SIZE, C), jnp.float32)
    dwb = 0.1 * jax.random.normal(k2, (N_NETS, N_LAYERS, C), jnp.float32)
    pww = (1.0 / jnp.sqrt(C)) * jax.random.normal(k3, (N_NETS, N_LAYERS, C, C), jnp.float32)
    pwb = 0.1 * jax.random.normal(k4, (N_NETS, N_LAYERS, C), jnp.float32)
    params = (dww, dwb, pww, pwb)

    out, new_caches = parent_net_forward([], x, params)
    out = jax.block_until_ready(out)

    assert out.shape == (B, C, T)
    assert new_caches == []
    ref = _reference_forward(x, params)
    max_err = float(jnp.max(jnp.abs(out - ref)))
    assert jnp.allclose(out, ref, atol=1e-3, rtol=1e-3), max_err
    print("KERNEL_OK")
</pallas_src>

<mosaic_0001>
module attributes {stable_mosaic.version = 11 : i64} {
  func.func @_parent_net_kernel(%arg0: memref<16x64xf32, #tpu.memory_space<vmem>>, %arg1: memref<5x3x128xf32, #tpu.memory_space<vmem>>, %arg2: memref<5x1x128xf32, #tpu.memory_space<vmem>>, %arg3: memref<5x128x128xf32, #tpu.memory_space<vmem>>, %arg4: memref<5x1x128xf32, #tpu.memory_space<vmem>>, %arg5: memref<16x64xf32, #tpu.memory_space<vmem>>) attributes {dimension_semantics = [], scalar_prefetch = 0 : i64, scratch_operands = 0 : i64, tpu.core_type = #tpu.core_type<tc>} {
    %c0 = arith.constant 0 : index
    %c0_0 = arith.constant 0 : index
    %0 = vector.load %arg0[%c0, %c0_0] : memref<16x64xf32, #tpu.memory_space<vmem>>, vector<16x64xf32>
    %1 = tpu.concatenate %0, %0 in 1 : vector<16x64xf32>, vector<16x64xf32> -> vector<16x128xf32>
    %2 = tpu.iota {dimensions = array<i32: 0>} : vector<16x128xi32>
    %c0_1 = arith.constant 0 : index
    %c0_2 = arith.constant 0 : index
    %c0_3 = arith.constant 0 : index
    %3 = vector.load %arg1[%c0_1, %c0_2, %c0_3] : memref<5x3x128xf32, #tpu.memory_space<vmem>>, vector<1x3x128xf32>
    %4 = vector.shape_cast %3 : vector<1x3x128xf32> to vector<3x128xf32>
    %c0_4 = arith.constant 0 : index
    %c0_5 = arith.constant 0 : index
    %c0_6 = arith.constant 0 : index
    %5 = vector.load %arg2[%c0_4, %c0_5, %c0_6] : memref<5x1x128xf32, #tpu.memory_space<vmem>>, vector<1x1x128xf32>
    %6 = vector.shape_cast %5 : vector<1x1x128xf32> to vector<1x128xf32>
    %c0_7 = arith.constant 0 : index
    %c0_8 = arith.constant 0 : index
    %c0_9 = arith.constant 0 : index
    %7 = vector.load %arg3[%c0_7, %c0_8, %c0_9] : memref<5x128x128xf32, #tpu.memory_space<vmem>>, vector<1x128x128xf32>
    %8 = vector.shape_cast %7 : vector<1x128x128xf32> to vector<128x128xf32>
    %c0_10 = arith.constant 0 : index
    %c0_11 = arith.constant 0 : index
    %c0_12 = arith.constant 0 : index
    %9 = vector.load %arg4[%c0_10, %c0_11, %c0_12] : memref<5x1x128xf32, #tpu.memory_space<vmem>>, vector<1x1x128xf32>
    %10 = vector.shape_cast %9 : vector<1x1x128xf32> to vector<1x128xf32>
    %11 = vector.extract_strided_slice %4 {offsets = [2, 0], sizes = [1, 128], strides = [1, 1]} : vector<3x128xf32> to vector<1x128xf32>
    %12 = vector.broadcast %11 : vector<1x128xf32> to vector<16x128xf32>
    %13 = arith.mulf %1, %12 : vector<16x128xf32>
    %14 = vector.broadcast %6 : vector<1x128xf32> to vector<16x128xf32>
    %15 = arith.addf %13, %14 : vector<16x128xf32>
    %c2_i32 = arith.constant 2 : i32
    %16 = tpu.dynamic_rotate %1 by %c2_i32 dim 0 : vector<16x128xf32>, i32 -> vector<16x128xf32>
    %c2_i32_13 = arith.constant 2 : i32
    %17 = vector.broadcast %c2_i32_13 : i32 to vector<16x128xi32>
    %18 = arith.cmpi sge, %2, %17 : vector<16x128xi32>
    %cst = arith.constant 0.000000e+00 : f32
    %19 = vector.broadcast %cst : f32 to vector<16x128xf32>
    %20 = arith.select %18, %16, %19 : vector<16x128xi1>, vector<16x128xf32>
    %21 = vector.extract_strided_slice %4 {offsets = [0, 0], sizes = [1, 128], strides = [1, 1]} : vector<3x128xf32> to vector<1x128xf32>
    %22 = vector.broadcast %21 : vector<1x128xf32> to vector<16x128xf32>
    %23 = arith.mulf %20, %22 : vector<16x128xf32>
    %24 = arith.addf %15, %23 : vector<16x128xf32>
    %c1_i32 = arith.constant 1 : i32
    %25 = tpu.dynamic_rotate %1 by %c1_i32 dim 0 : vector<16x128xf32>, i32 -> vector<16x128xf32>
    %c1_i32_14 = arith.constant 1 : i32
    %26 = vector.broadcast %c1_i32_14 : i32 to vector<16x128xi32>
    %27 = arith.cmpi sge, %2, %26 : vector<16x128xi32>
    %cst_15 = arith.constant 0.000000e+00 : f32
    %28 = vector.broadcast %cst_15 : f32 to vector<16x128xf32>
    %29 = arith.select %27, %25, %28 : vector<16x128xi1>, vector<16x128xf32>
    %30 = vector.extract_strided_slice %4 {offsets = [1, 0], sizes = [1, 128], strides = [1, 1]} : vector<3x128xf32> to vector<1x128xf32>
    %31 = vector.broadcast %30 : vector<1x128xf32> to vector<16x128xf32>
    %32 = arith.mulf %29, %31 : vector<16x128xf32>
    %33 = arith.addf %24, %32 : vector<16x128xf32>
    %34 = arith.mulf %33, %33 : vector<16x128xf32>
    %35 = arith.mulf %33, %34 : vector<16x128xf32>
    %cst_16 = arith.constant 4.471500e-02 : f32
    %36 = vector.broadcast %cst_16 : f32 to vector<16x128xf32>
    %37 = arith.mulf %36, %35 : vector<16x128xf32>
    %38 = arith.addf %33, %37 : vector<16x128xf32>
    %cst_17 = arith.constant 0.797884583 : f32
    %39 = vector.broadcast %cst_17 : f32 to vector<16x128xf32>
    %40 = arith.mulf %39, %38 : vector<16x128xf32>
    %41 = math.tanh %40 : vector<16x128xf32>
    %cst_18 = arith.constant 1.000000e+00 : f32
    %42 = vector.broadcast %cst_18 : f32 to vector<16x128xf32>
    %43 = arith.addf %42, %41 : vector<16x128xf32>
    %cst_19 = arith.constant 5.000000e-01 : f32
    %44 = vector.broadcast %cst_19 : f32 to vector<16x128xf32>
    %45 = arith.mulf %44, %43 : vector<16x128xf32>
    %46 = arith.mulf %33, %45 : vector<16x128xf32>
    %cst_20 = arith.constant dense<0.000000e+00> : vector<16x128xf32>
    %47 = tpu.matmul %46, %8, %cst_20 {dimension_numbers = #tpu.dot_dimension_numbers<[1], [1], [0], [0], [0, 0, 1, 0], [], []>} : vector<16x128xf32>, vector<128x128xf32>, vector<16x128xf32> -> vector<16x128xf32>
    %48 = vector.broadcast %10 : vector<1x128xf32> to vector<16x128xf32>
    %49 = arith.addf %47, %48 : vector<16x128xf32>
    %50 = arith.mulf %49, %49 : vector<16x128xf32>
    %51 = arith.mulf %49, %50 : vector<16x128xf32>
    %cst_21 = arith.constant 4.471500e-02 : f32
    %52 = vector.broadcast %cst_21 : f32 to vector<16x128xf32>
    %53 = arith.mulf %52, %51 : vector<16x128xf32>
    %54 = arith.addf %49, %53 : vector<16x128xf32>
    %cst_22 = arith.constant 0.797884583 : f32
    %55 = vector.broadcast %cst_22 : f32 to vector<16x128xf32>
    %56 = arith.mulf %55, %54 : vector<16x128xf32>
    %57 = math.tanh %56 : vector<16x128xf32>
    %cst_23 = arith.constant 1.000000e+00 : f32
    %58 = vector.broadcast %cst_23 : f32 to vector<16x128xf32>
    %59 = arith.addf %58, %57 : vector<16x128xf32>
    %cst_24 = arith.constant 5.000000e-01 : f32
    %60 = vector.broadcast %cst_24 : f32 to vector<16x128xf32>
    %61 = arith.mulf %60, %59 : vector<16x128xf32>
    %62 = arith.mulf %49, %61 : vector<16x128xf32>
    %63 = arith.addf %1, %62 : vector<16x128xf32>
    %c1 = arith.constant 1 : index
    %c0_25 = arith.constant 0 : index
    %c0_26 = arith.constant 0 : index
    %64 = vector.load %arg1[%c1, %c0_25, %c0_26] : memref<5x3x128xf32, #tpu.memory_space<vmem>>, vector<1x3x128xf32>
    %65 = vector.shape_cast %64 : vector<1x3x128xf32> to vector<3x128xf32>
    %c1_27 = arith.constant 1 : index
    %c0_28 = arith.constant 0 : index
    %c0_29 = arith.constant 0 : index
    %66 = vector.load %arg2[%c1_27, %c0_28, %c0_29] : memref<5x1x128xf32, #tpu.memory_space<vmem>>, vector<1x1x128xf32>
    %67 = vector.shape_cast %66 : vector<1x1x128xf32> to vector<1x128xf32>
    %c1_30 = arith.constant 1 : index
    %c0_31 = arith.constant 0 : index
    %c0_32 = arith.constant 0 : index
    %68 = vector.load %arg3[%c1_30, %c0_31, %c0_32] : memref<5x128x128xf32, #tpu.memory_space<vmem>>, vector<1x128x128xf32>
    %69 = vector.shape_cast %68 : vector<1x128x128xf32> to vector<128x128xf32>
    %c1_33 = arith.constant 1 : index
    %c0_34 = arith.constant 0 : index
    %c0_35 = arith.constant 0 : index
    %70 = vector.load %arg4[%c1_33, %c0_34, %c0_35] : memref<5x1x128xf32, #tpu.memory_space<vmem>>, vector<1x1x128xf32>
    %71 = vector.shape_cast %70 : vector<1x1x128xf32> to vector<1x128xf32>
    %72 = vector.extract_strided_slice %65 {offsets = [2, 0], sizes = [1, 128], strides = [1, 1]} : vector<3x128xf32> to vector<1x128xf32>
    %73 = vector.broadcast %72 : vector<1x128xf32> to vector<16x128xf32>
    %74 = arith.mulf %63, %73 : vector<16x128xf32>
    %75 = vector.broadcast %67 : vector<1x128xf32> to vector<16x128xf32>
    %76 = arith.addf %74, %75 : vector<16x128xf32>
    %c4_i32 = arith.constant 4 : i32
    %77 = tpu.dynamic_rotate %63 by %c4_i32 dim 0 : vector<16x128xf32>, i32 -> vector<16x128xf32>
    %c4_i32_36 = arith.constant 4 : i32
    %78 = vector.broadcast %c4_i32_36 : i32 to vector<16x128xi32>
    %79 = arith.cmpi sge, %2, %78 : vector<16x128xi32>
    %cst_37 = arith.constant 0.000000e+00 : f32
    %80 = vector.broadcast %cst_37 : f32 to vector<16x128xf32>
    %81 = arith.select %79, %77, %80 : vector<16x128xi1>, vector<16x128xf32>
    %82 = vector.extract_strided_slice %65 {offsets = [0, 0], sizes = [1, 128], strides = [1, 1]} : vector<3x128xf32> to vector<1x128xf32>
    %83 = vector.broadcast %82 : vector<1x128xf32> to vector<16x128xf32>
    %84 = arith.mulf %81, %83 : vector<16x128xf32>
    %85 = arith.addf %76, %84 : vector<16x128xf32>
    %c2_i32_38 = arith.constant 2 : i32
    %86 = tpu.dynamic_rotate %63 by %c2_i32_38 dim 0 : vector<16x128xf32>, i32 -> vector<16x128xf32>
    %c2_i32_39 = arith.constant 2 : i32
    %87 = vector.broadcast %c2_i32_39 : i32 to vector<16x128xi32>
    %88 = arith.cmpi sge, %2, %87 : vector<16x128xi32>
    %cst_40 = arith.constant 0.000000e+00 : f32
    %89 = vector.broadcast %cst_40 : f32 to vector<16x128xf32>
    %90 = arith.select %88, %86, %89 : vector<16x128xi1>, vector<16x128xf32>
    %91 = vector.extract_strided_slice %65 {offsets = [1, 0], sizes = [1, 128], strides = [1, 1]} : vector<3x128xf32> to vector<1x128xf32>
    %92 = vector.broadcast %91 : vector<1x128xf32> to vector<16x128xf32>
    %93 = arith.mulf %90, %92 : vector<16x128xf32>
    %94 = arith.addf %85, %93 : vector<16x128xf32>
    %95 = arith.mulf %94, %94 : vector<16x128xf32>
    %96 = arith.mulf %94, %95 : vector<16x128xf32>
    %cst_41 = arith.constant 4.471500e-02 : f32
    %97 = vector.broadcast %cst_41 : f32 to vector<16x128xf32>
    %98 = arith.mulf %97, %96 : vector<16x128xf32>
    %99 = arith.addf %94, %98 : vector<16x128xf32>
    %cst_42 = arith.constant 0.797884583 : f32
    %100 = vector.broadcast %cst_42 : f32 to vector<16x128xf32>
    %101 = arith.mulf %100, %99 : vector<16x128xf32>
    %102 = math.tanh %101 : vector<16x128xf32>
    %cst_43 = arith.constant 1.000000e+00 : f32
    %103 = vector.broadcast %cst_43 : f32 to vector<16x128xf32>
    %104 = arith.addf %103, %102 : vector<16x128xf32>
    %cst_44 = arith.constant 5.000000e-01 : f32
    %105 = vector.broadcast %cst_44 : f32 to vector<16x128xf32>
    %106 = arith.mulf %105, %104 : vector<16x128xf32>
    %107 = arith.mulf %94, %106 : vector<16x128xf32>
    %cst_45 = arith.constant dense<0.000000e+00> : vector<16x128xf32>
    %108 = tpu.matmul %107, %69, %cst_45 {dimension_numbers = #tpu.dot_dimension_numbers<[1], [1], [0], [0], [0, 0, 1, 0], [], []>} : vector<16x128xf32>, vector<128x128xf32>, vector<16x128xf32> -> vector<16x128xf32>
    %109 = vector.broadcast %71 : vector<1x128xf32> to vector<16x128xf32>
    %110 = arith.addf %108, %109 : vector<16x128xf32>
    %111 = arith.mulf %110, %110 : vector<16x128xf32>
    %112 = arith.mulf %110, %111 : vector<16x128xf32>
    %cst_46 = arith.constant 4.471500e-02 : f32
    %113 = vector.broadcast %cst_46 : f32 to vector<16x128xf32>
    %114 = arith.mulf %113, %112 : vector<16x128xf32>
    %115 = arith.addf %110, %114 : vector<16x128xf32>
    %cst_47 = arith.constant 0.797884583 : f32
    %116 = vector.broadcast %cst_47 : f32 to vector<16x128xf32>
    %117 = arith.mulf %116, %115 : vector<16x128xf32>
    %118 = math.tanh %117 : vector<16x128xf32>
    %cst_48 = arith.constant 1.000000e+00 : f32
    %119 = vector.broadcast %cst_48 : f32 to vector<16x128xf32>
    %120 = arith.addf %119, %118 : vector<16x128xf32>
    %cst_49 = arith.constant 5.000000e-01 : f32
    %121 = vector.broadcast %cst_49 : f32 to vector<16x128xf32>
    %122 = arith.mulf %121, %120 : vector<16x128xf32>
    %123 = arith.mulf %110, %122 : vector<16x128xf32>
    %124 = arith.addf %63, %123 : vector<16x128xf32>
    %c2 = arith.constant 2 : index
    %c0_50 = arith.constant 0 : index
    %c0_51 = arith.constant 0 : index
    %125 = vector.load %arg1[%c2, %c0_50, %c0_51] : memref<5x3x128xf32, #tpu.memory_space<vmem>>, vector<1x3x128xf32>
    %126 = vector.shape_cast %125 : vector<1x3x128xf32> to vector<3x128xf32>
    %c2_52 = arith.constant 2 : index
    %c0_53 = arith.constant 0 : index
    %c0_54 = arith.constant 0 : index
    %127 = vector.load %arg2[%c2_52, %c0_53, %c0_54] : memref<5x1x128xf32, #tpu.memory_space<vmem>>, vector<1x1x128xf32>
    %128 = vector.shape_cast %127 : vector<1x1x128xf32> to vector<1x128xf32>
    %c2_55 = arith.constant 2 : index
    %c0_56 = arith.constant 0 : index
    %c0_57 = arith.constant 0 : index
    %129 = vector.load %arg3[%c2_55, %c0_56, %c0_57] : memref<5x128x128xf32, #tpu.memory_space<vmem>>, vector<1x128x128xf32>
    %130 = vector.shape_cast %129 : vector<1x128x128xf32> to vector<128x128xf32>
    %c2_58 = arith.constant 2 : index
    %c0_59 = arith.constant 0 : index
    %c0_60 = arith.constant 0 : index
    %131 = vector.load %arg4[%c2_58, %c0_59, %c0_60] : memref<5x1x128xf32, #tpu.memory_space<vmem>>, vector<1x1x128xf32>
    %132 = vector.shape_cast %131 : vector<1x1x128xf32> to vector<1x128xf32>
    %133 = vector.extract_strided_slice %126 {offsets = [2, 0], sizes = [1, 128], strides = [1, 1]} : vector<3x128xf32> to vector<1x128xf32>
    %134 = vector.broadcast %133 : vector<1x128xf32> to vector<16x128xf32>
    %135 = arith.mulf %124, %134 : vector<16x128xf32>
    %136 = vector.broadcast %128 : vector<1x128xf32> to vector<16x128xf32>
    %137 = arith.addf %135, %136 : vector<16x128xf32>
    %c8_i32 = arith.constant 8 : i32
    %138 = tpu.dynamic_rotate %124 by %c8_i32 dim 0 : vector<16x128xf32>, i32 -> vector<16x128xf32>
    %c8_i32_61 = arith.constant 8 : i32
    %139 = vector.broadcast %c8_i32_61 : i32 to vector<16x128xi32>
    %140 = arith.cmpi sge, %2, %139 : vector<16x128xi32>
    %cst_62 = arith.constant 0.000000e+00 : f32
    %141 = vector.broadcast %cst_62 : f32 to vector<16x128xf32>
    %142 = arith.select %140, %138, %141 : vector<16x128xi1>, vector<16x128xf32>
    %143 = vector.extract_strided_slice %126 {offsets = [0, 0], sizes = [1, 128], strides = [1, 1]} : vector<3x128xf32> to vector<1x128xf32>
    %144 = vector.broadcast %143 : vector<1x128xf32> to vector<16x128xf32>
    %145 = arith.mulf %142, %144 : vector<16x128xf32>
    %146 = arith.addf %137, %145 : vector<16x128xf32>
    %c4_i32_63 = arith.constant 4 : i32
    %147 = tpu.dynamic_rotate %124 by %c4_i32_63 dim 0 : vector<16x128xf32>, i32 -> vector<16x128xf32>
    %c4_i32_64 = arith.constant 4 : i32
    %148 = vector.broadcast %c4_i32_64 : i32 to vector<16x128xi32>
    %149 = arith.cmpi sge, %2, %148 : vector<16x128xi32>
    %cst_65 = arith.constant 0.000000e+00 : f32
    %150 = vector.broadcast %cst_65 : f32 to vector<16x128xf32>
    %151 = arith.select %149, %147, %150 : vector<16x128xi1>, vector<16x128xf32>
    %152 = vector.extract_strided_slice %126 {offsets = [1, 0], sizes = [1, 128], strides = [1, 1]} : vector<3x128xf32> to vector<1x128xf32>
    %153 = vector.broadcast %152 : vector<1x128xf32> to vector<16x128xf32>
    %154 = arith.mulf %151, %153 : vector<16x128xf32>
    %155 = arith.addf %146, %154 : vector<16x128xf32>
    %156 = arith.mulf %155, %155 : vector<16x128xf32>
    %157 = arith.mulf %155, %156 : vector<16x128xf32>
    %cst_66 = arith.constant 4.471500e-02 : f32
    %158 = vector.broadcast %cst_66 : f32 to vector<16x128xf32>
    %159 = arith.mulf %158, %157 : vector<16x128xf32>
    %160 = arith.addf %155, %159 : vector<16x128xf32>
    %cst_67 = arith.constant 0.797884583 : f32
    %161 = vector.broadcast %cst_67 : f32 to vector<16x128xf32>
    %162 = arith.mulf %161, %160 : vector<16x128xf32>
    %163 = math.tanh %162 : vector<16x128xf32>
    %cst_68 = arith.constant 1.000000e+00 : f32
    %164 = vector.broadcast %cst_68 : f32 to vector<16x128xf32>
    %165 = arith.addf %164, %163 : vector<16x128xf32>
    %cst_69 = arith.constant 5.000000e-01 : f32
    %166 = vector.broadcast %cst_69 : f32 to vector<16x128xf32>
    %167 = arith.mulf %166, %165 : vector<16x128xf32>
    %168 = arith.mulf %155, %167 : vector<16x128xf32>
    %cst_70 = arith.constant dense<0.000000e+00> : vector<16x128xf32>
    %169 = tpu.matmul %168, %130, %cst_70 {dimension_numbers = #tpu.dot_dimension_numbers<[1], [1], [0], [0], [0, 0, 1, 0], [], []>} : vector<16x128xf32>, vector<128x128xf32>, vector<16x128xf32> -> vector<16x128xf32>
    %170 = vector.broadcast %132 : vector<1x128xf32> to vector<16x128xf32>
    %171 = arith.addf %169, %170 : vector<16x128xf32>
    %172 = arith.mulf %171, %171 : vector<16x128xf32>
    %173 = arith.mulf %171, %172 : vector<16x128xf32>
    %cst_71 = arith.constant 4.471500e-02 : f32
    %174 = vector.broadcast %cst_71 : f32 to vector<16x128xf32>
    %175 = arith.mulf %174, %173 : vector<16x128xf32>
    %176 = arith.addf %171, %175 : vector<16x128xf32>
    %cst_72 = arith.constant 0.797884583 : f32
    %177 = vector.broadcast %cst_72 : f32 to vector<16x128xf32>
    %178 = arith.mulf %177, %176 : vector<16x128xf32>
    %179 = math.tanh %178 : vector<16x128xf32>
    %cst_73 = arith.constant 1.000000e+00 : f32
    %180 = vector.broadcast %cst_73 : f32 to vector<16x128xf32>
    %181 = arith.addf %180, %179 : vector<16x128xf32>
    %cst_74 = arith.constant 5.000000e-01 : f32
    %182 = vector.broadcast %cst_74 : f32 to vector<16x128xf32>
    %183 = arith.mulf %182, %181 : vector<16x128xf32>
    %184 = arith.mulf %171, %183 : vector<16x128xf32>
    %185 = arith.addf %124, %184 : vector<16x128xf32>
    %c3 = arith.constant 3 : index
    %c0_75 = arith.constant 0 : index
    %c0_76 = arith.constant 0 : index
    %186 = vector.load %arg1[%c3, %c0_75, %c0_76] : memref<5x3x128xf32, #tpu.memory_space<vmem>>, vector<1x3x128xf32>
    %187 = vector.shape_cast %186 : vector<1x3x128xf32> to vector<3x128xf32>
    %c3_77 = arith.constant 3 : index
    %c0_78 = arith.constant 0 : index
    %c0_79 = arith.constant 0 : index
    %188 = vector.load %arg2[%c3_77, %c0_78, %c0_79] : memref<5x1x128xf32, #tpu.memory_space<vmem>>, vector<1x1x128xf32>
    %189 = vector.shape_cast %188 : vector<1x1x128xf32> to vector<1x128xf32>
    %c3_80 = arith.constant 3 : index
    %c0_81 = arith.constant 0 : index
    %c0_82 = arith.constant 0 : index
    %190 = vector.load %arg3[%c3_80, %c0_81, %c0_82] : memref<5x128x128xf32, #tpu.memory_space<vmem>>, vector<1x128x128xf32>
    %191 = vector.shape_cast %190 : vector<1x128x128xf32> to vector<128x128xf32>
    %c3_83 = arith.constant 3 : index
    %c0_84 = arith.constant 0 : index
    %c0_85 = arith.constant 0 : index
    %192 = vector.load %arg4[%c3_83, %c0_84, %c0_85] : memref<5x1x128xf32, #tpu.memory_space<vmem>>, vector<1x1x128xf32>
    %193 = vector.shape_cast %192 : vector<1x1x128xf32> to vector<1x128xf32>
    %194 = vector.extract_strided_slice %187 {offsets = [2, 0], sizes = [1, 128], strides = [1, 1]} : vector<3x128xf32> to vector<1x128xf32>
    %195 = vector.broadcast %194 : vector<1x128xf32> to vector<16x128xf32>
    %196 = arith.mulf %185, %195 : vector<16x128xf32>
    %197 = vector.broadcast %189 : vector<1x128xf32> to vector<16x128xf32>
    %198 = arith.addf %196, %197 : vector<16x128xf32>
    %c8_i32_86 = arith.constant 8 : i32
    %199 = tpu.dynamic_rotate %185 by %c8_i32_86 dim 0 : vector<16x128xf32>, i32 -> vector<16x128xf32>
    %c8_i32_87 = arith.constant 8 : i32
    %200 = vector.broadcast %c8_i32_87 : i32 to vector<16x128xi32>
    %201 = arith.cmpi sge, %2, %200 : vector<16x128xi32>
    %cst_88 = arith.constant 0.000000e+00 : f32
    %202 = vector.broadcast %cst_88 : f32 to vector<16x128xf32>
    %203 = arith.select %201, %199, %202 : vector<16x128xi1>, vector<16x128xf32>
    %204 = vector.extract_strided_slice %187 {offsets = [1, 0], sizes = [1, 128], strides = [1, 1]} : vector<3x128xf32> to vector<1x128xf32>
    %205 = vector.broadcast %204 : vector<1x128xf32> to vector<16x128xf32>
    %206 = arith.mulf %203, %205 : vector<16x128xf32>
    %207 = arith.addf %198, %206 : vector<16x128xf32>
    %208 = arith.mulf %207, %207 : vector<16x128xf32>
    %209 = arith.mulf %207, %208 : vector<16x128xf32>
    %cst_89 = arith.constant 4.471500e-02 : f32
    %210 = vector.broadcast %cst_89 : f32 to vector<16x128xf32>
    %211 = arith.mulf %210, %209 : vector<16x128xf32>
    %212 = arith.addf %207, %211 : vector<16x128xf32>
    %cst_90 = arith.constant 0.797884583 : f32
    %213 = vector.broadcast %cst_90 : f32 to vector<16x128xf32>
    %214 = arith.mulf %213, %212 : vector<16x128xf32>
    %215 = math.tanh %214 : vector<16x128xf32>
    %cst_91 = arith.constant 1.000000e+00 : f32
    %216 = vector.broadcast %cst_91 : f32 to vector<16x128xf32>
    %217 = arith.addf %216, %215 : vector<16x128xf32>
    %cst_92 = arith.constant 5.000000e-01 : f32
    %218 = vector.broadcast %cst_92 : f32 to vector<16x128xf32>
    %219 = arith.mulf %218, %217 : vector<16x128xf32>
    %220 = arith.mulf %207, %219 : vector<16x128xf32>
    %cst_93 = arith.constant dense<0.000000e+00> : vector<16x128xf32>
    %221 = tpu.matmul %220, %191, %cst_93 {dimension_numbers = #tpu.dot_dimension_numbers<[1], [1], [0], [0], [0, 0, 1, 0], [], []>} : vector<16x128xf32>, vector<128x128xf32>, vector<16x128xf32> -> vector<16x128xf32>
    %222 = vector.broadcast %193 : vector<1x128xf32> to vector<16x128xf32>
    %223 = arith.addf %221, %222 : vector<16x128xf32>
    %224 = arith.mulf %223, %223 : vector<16x128xf32>
    %225 = arith.mulf %223, %224 : vector<16x128xf32>
    %cst_94 = arith.constant 4.471500e-02 : f32
    %226 = vector.broadcast %cst_94 : f32 to vector<16x128xf32>
    %227 = arith.mulf %226, %225 : vector<16x128xf32>
    %228 = arith.addf %223, %227 : vector<16x128xf32>
    %cst_95 = arith.constant 0.797884583 : f32
    %229 = vector.broadcast %cst_95 : f32 to vector<16x128xf32>
    %230 = arith.mulf %229, %228 : vector<16x128xf32>
    %231 = math.tanh %230 : vector<16x128xf32>
    %cst_96 = arith.constant 1.000000e+00 : f32
    %232 = vector.broadcast %cst_96 : f32 to vector<16x128xf32>
    %233 = arith.addf %232, %231 : vector<16x128xf32>
    %cst_97 = arith.constant 5.000000e-01 : f32
    %234 = vector.broadcast %cst_97 : f32 to vector<16x128xf32>
    %235 = arith.mulf %234, %233 : vector<16x128xf32>
    %236 = arith.mulf %223, %235 : vector<16x128xf32>
    %237 = arith.addf %185, %236 : vector<16x128xf32>
    %c4 = arith.constant 4 : index
    %c0_98 = arith.constant 0 : index
    %c0_99 = arith.constant 0 : index
    %238 = vector.load %arg1[%c4, %c0_98, %c0_99] : memref<5x3x128xf32, #tpu.memory_space<vmem>>, vector<1x3x128xf32>
    %239 = vector.shape_cast %238 : vector<1x3x128xf32> to vector<3x128xf32>
    %c4_100 = arith.constant 4 : index
    %c0_101 = arith.constant 0 : index
    %c0_102 = arith.constant 0 : index
    %240 = vector.load %arg2[%c4_100, %c0_101, %c0_102] : memref<5x1x128xf32, #tpu.memory_space<vmem>>, vector<1x1x128xf32>
    %241 = vector.shape_cast %240 : vector<1x1x128xf32> to vector<1x128xf32>
    %c4_103 = arith.constant 4 : index
    %c0_104 = arith.constant 0 : index
    %c0_105 = arith.constant 0 : index
    %242 = vector.load %arg3[%c4_103, %c0_104, %c0_105] : memref<5x128x128xf32, #tpu.memory_space<vmem>>, vector<1x128x128xf32>
    %243 = vector.shape_cast %242 : vector<1x128x128xf32> to vector<128x128xf32>
    %c4_106 = arith.constant 4 : index
    %c0_107 = arith.constant 0 : index
    %c0_108 = arith.constant 0 : index
    %244 = vector.load %arg4[%c4_106, %c0_107, %c0_108] : memref<5x1x128xf32, #tpu.memory_space<vmem>>, vector<1x1x128xf32>
    %245 = vector.shape_cast %244 : vector<1x1x128xf32> to vector<1x128xf32>
    %246 = vector.extract_strided_slice %239 {offsets = [2, 0], sizes = [1, 128], strides = [1, 1]} : vector<3x128xf32> to vector<1x128xf32>
    %247 = vector.broadcast %246 : vector<1x128xf32> to vector<16x128xf32>
    %248 = arith.mulf %237, %247 : vector<16x128xf32>
    %249 = vector.broadcast %241 : vector<1x128xf32> to vector<16x128xf32>
    %250 = arith.addf %248, %249 : vector<16x128xf32>
    %251 = arith.mulf %250, %250 : vector<16x128xf32>
    %252 = arith.mulf %250, %251 : vector<16x128xf32>
    %cst_109 = arith.constant 4.471500e-02 : f32
    %253 = vector.broadcast %cst_109 : f32 to vector<16x128xf32>
    %254 = arith.mulf %253, %252 : vector<16x128xf32>
    %255 = arith.addf %250, %254 : vector<16x128xf32>
    %cst_110 = arith.constant 0.797884583 : f32
    %256 = vector.broadcast %cst_110 : f32 to vector<16x128xf32>
    %257 = arith.mulf %256, %255 : vector<16x128xf32>
    %258 = math.tanh %257 : vector<16x128xf32>
    %cst_111 = arith.constant 1.000000e+00 : f32
    %259 = vector.broadcast %cst_111 : f32 to vector<16x128xf32>
    %260 = arith.addf %259, %258 : vector<16x128xf32>
    %cst_112 = arith.constant 5.000000e-01 : f32
    %261 = vector.broadcast %cst_112 : f32 to vector<16x128xf32>
    %262 = arith.mulf %261, %260 : vector<16x128xf32>
    %263 = arith.mulf %250, %262 : vector<16x128xf32>
    %cst_113 = arith.constant dense<0.000000e+00> : vector<16x128xf32>
    %264 = tpu.matmul %263, %243, %cst_113 {dimension_numbers = #tpu.dot_dimension_numbers<[1], [1], [0], [0], [0, 0, 1, 0], [], []>} : vector<16x128xf32>, vector<128x128xf32>, vector<16x128xf32> -> vector<16x128xf32>
    %265 = vector.broadcast %245 : vector<1x128xf32> to vector<16x128xf32>
    %266 = arith.addf %264, %265 : vector<16x128xf32>
    %267 = arith.mulf %266, %266 : vector<16x128xf32>
    %268 = arith.mulf %266, %267 : vector<16x128xf32>
    %cst_114 = arith.constant 4.471500e-02 : f32
    %269 = vector.broadcast %cst_114 : f32 to vector<16x128xf32>
    %270 = arith.mulf %269, %268 : vector<16x128xf32>
    %271 = arith.addf %266, %270 : vector<16x128xf32>
    %cst_115 = arith.constant 0.797884583 : f32
    %272 = vector.broadcast %cst_115 : f32 to vector<16x128xf32>
    %273 = arith.mulf %272, %271 : vector<16x128xf32>
    %274 = math.tanh %273 : vector<16x128xf32>
    %cst_116 = arith.constant 1.000000e+00 : f32
    %275 = vector.broadcast %cst_116 : f32 to vector<16x128xf32>
    %276 = arith.addf %275, %274 : vector<16x128xf32>
    %cst_117 = arith.constant 5.000000e-01 : f32
    %277 = vector.broadcast %cst_117 : f32 to vector<16x128xf32>
    %278 = arith.mulf %277, %276 : vector<16x128xf32>
    %279 = arith.mulf %266, %278 : vector<16x128xf32>
    %280 = arith.addf %237, %279 : vector<16x128xf32>
    %281 = vector.extract_strided_slice %280 {offsets = [0, 0], sizes = [16, 64], strides = [1, 1]} : vector<16x128xf32> to vector<16x64xf32>
    %282 = vector.extract_strided_slice %280 {offsets = [0, 64], sizes = [16, 64], strides = [1, 1]} : vector<16x128xf32> to vector<16x64xf32>
    %283 = arith.addf %281, %282 : vector<16x64xf32>
    %c0_118 = arith.constant 0 : index
    %c0_119 = arith.constant 0 : index
    %284 = vector.load %arg5[%c0_118, %c0_119] : memref<16x64xf32, #tpu.memory_space<vmem>>, vector<16x64xf32>
    tpu.vector_store %arg5[%c0_118, %c0_119], %283 {strides = array<i32>} : memref<16x64xf32, #tpu.memory_space<vmem>>, vector<16x64xf32>,
    return
  }
}

</mosaic_0001>

<bundles_post_ra>
// kernel: tpu_custom_call.1
= control target key start
LH: loop header
LB: loop body
LE: loop exit
PB: predicated region body
PF: predicated region fallthrough
CT: control target
= control target key end

     0   :  { %10 = vsyncpa [#allocation3], 0  ;;  %s1633_s0 = inlined_call_operand.hbm [shape: f32[16,64], index: 0, kind: input, shape index: {}]   ;;  %s1634_s1 = inlined_call_operand.hbm [shape: f32[5,3,128], index: 1, kind: input, shape index: {}]   ;;  %s1635_s2 = inlined_call_operand.hbm [shape: f32[5,1,128], index: 2, kind: input, shape index: {}]   ;;  %s1636_s3 = inlined_call_operand.hbm [shape: f32[5,128,128], index: 3, kind: input, shape index: {}]   ;;  %s1637_s4 = inlined_call_operand.vmem [shape: f32[5,1,128], index: 4, kind: input, shape index: {}]   ;;  %s1638_s5 = inlined_call_operand.hbm [shape: f32[16,64], index: 5, kind: output, shape index: {}]  }
   0x1   :  { %11 = vsyncpa [#allocation6], 0 }
   0x2   :  { %12 = vsyncpa [#allocation9], 0 }
   0x3   :  { %13 = vsyncpa [#allocation4], 0  ;;  %s1438_s18 = smov [#allocation5]  }
   0x4   :  { %s31_s19 = sshll.u32 %s1438_s18, 4  ;;  %s32_s19 = int_to_ptr.vmem [resolvable:$true] %s31_s19 }
   0x5   :  { %s1338_s20 = scalar_lea.vmem %s32_s19, 320  ;;  %p1343_p1 = scmp.lt.s32.totalorder %s32_s19, %s32_s19 }
   0x6   :  { %p1339_p0 = scmp.ne.s32.totalorder %s32_s19, %s1338_s20  ;;  %p1344_p2 = scmp.lt.s32.totalorder %s1338_s20, %s1338_s20 }
   0x8   :  { %p1345_p3 = por %p1344_p2, %p1343_p1 }
   0xa   :  { %p1346_p4 = pnand %p1345_p3, %p1339_p0 }
   0xc   :  { %1349 = shalt.err (!%p1346_p4)
}
   0xd   :  { %s1439_s21 = smov 64   ;;  %s1440_s22 = smov 4  }
   0xe   :  { %37 = dma.hbm_to_vmem [thread:$0]  %s1634_s1, 320, %s32_s19, [#allocation6], %s1439_s21, %s1439_s21, %s1440_s22  }
   0xf   :  { %s1441_s25 = smov [#allocation2]  }
  0x10   :  { %s19_s26 = sshll.u32 %s1441_s25, 4  ;;  %s20_s26 = int_to_ptr.vmem [resolvable:$true] %s19_s26 }
  0x11   :  { %s1358_s27 = scalar_lea.vmem %s20_s26, 256  ;;  %p1363_p6 = scmp.lt.s32.totalorder %s20_s26, %s20_s26 }
  0x12   :  { %p1359_p5 = scmp.ne.s32.totalorder %s20_s26, %s1358_s27  ;;  %p1364_p7 = scmp.lt.s32.totalorder %s1358_s27, %s1358_s27 }
  0x14   :  { %p1365_p8 = por %p1364_p7, %p1363_p6 }
  0x16   :  { %p1366_p9 = pnand %p1365_p8, %p1359_p5 }
  0x18   :  { %1369 = shalt.err (!%p1366_p9)
}
  0x19   :  { %s1442_s28 = smov 128   ;;  %s1443_s29 = smov 8  }
  0x1a   :  { %25 = dma.hbm_to_vmem [thread:$0]  %s1633_s0, 256, %s20_s26, [#allocation3], %s1442_s28, %s1442_s28, %s1443_s29  }
  0x1b   :  { %s1444_s1 = smov [#allocation7]  }
  0x1c   :  { %s43_s7 = sshll.u32 %s1444_s1, 4  ;;  %s44_s7 = int_to_ptr.vmem [resolvable:$true] %s43_s7 }
  0x1d   :  { %s1378_s8 = scalar_lea.vmem %s44_s7, 80  ;;  %s1382_s9 = scalar_lea.vmem %s44_s7, 96 }
  0x1e   :  { %p1379_p10 = scmp.ne.s32.totalorder %s44_s7, %s1378_s8  ;;  %p1383_p11 = scmp.lt.s32.totalorder %s44_s7, %s44_s7 }
  0x1f   :  { %p1384_p12 = scmp.lt.s32.totalorder %s1382_s9, %s1378_s8 }
  0x21   :  { %p1385_p13 = por %p1384_p12, %p1383_p11 }
  0x23   :  { %p1386_p0 = pnand %p1385_p13, %p1379_p10 }
  0x25   :  { %1389 = shalt.err (!%p1386_p0)
}
  0x26   :  { %s1445_s10 = smov 16   ;;  %s1446_s11 = smov 1  }
  0x27   :  { %49 = dma.hbm_to_vmem [thread:$0]  %s1635_s2, 80, %s44_s7, [#allocation6], %s1445_s10, %s1445_s10, %s1446_s11  }
  0x28   :  { %s1447_s14 = smov [#allocation8]  }
  0x29   :  { %s55_s15 = sshll.u32 %s1447_s14, 4  ;;  %s56_s15 = int_to_ptr.vmem [resolvable:$true] %s55_s15 }
  0x2a   :  { %s1398_s0 = scalar_lea.vmem %s56_s15, 10240  ;;  %p1403_p2 = scmp.lt.s32.totalorder %s56_s15, %s56_s15 }
  0x2b   :  { %p1399_p1 = scmp.ne.s32.totalorder %s56_s15, %s1398_s0  ;;  %p1404_p3 = scmp.lt.s32.totalorder %s1398_s0, %s1398_s0 }
  0x2d   :  { %p1405_p4 = por %p1404_p3, %p1403_p2 }
  0x2f   :  { %p1406_p5 = pnand %p1405_p4, %p1399_p1 }
  0x31   :  { %1409 = shalt.err (!%p1406_p5)
}
  0x32   :  { %61 = dma.hbm_to_vmem [thread:$0]  %s1636_s3, 10240, %s56_s15, [#allocation9], %s1442_s28, %s1442_s28, %s1443_s29  }
  0x33   :  { %1430 = dma.done.wait [#allocation3], 256  }
  0x34   :  { %1431 = vsyncadd [#allocation3], 4294967040 }
  0x35   :  { %1432 = dma.done.wait [#allocation6], 400  }
  0x36   :  { %1433 = vsyncadd [#allocation6], 4294966896 }
  0x37   :  { %1434 = dma.done.wait [#allocation9], 10240  }
  0x38   :  { %1435 = vsyncadd [#allocation9], 4294957056  ;;  %v76_v0 = vld [vmem:[#allocation2] sm:$0xff]  ;;  %v1500_v3 = vld [vmem:[#allocation2 + $0x8] sm:$0xff]  ;;  %v89_v18 = vlaneseq  ;;  %vm86_vm0 = vcmask 523264  }
  0x39   :  { %v109_v1 = vld [vmem:[#allocation8 + $0x78] sm:$0xff]  ;;  %80 = vrot.lane.b32.xlu0 %v76_v0, %s1439_s21  ;;  %v108_v2 = vld [vmem:[#allocation8 + $0x70] sm:$0xff]  ;;  %v107_v4 = vld [vmem:[#allocation8 + $0x68] sm:$0xff] }
  0x3a   :  { %1104 = vmatprep.subr.mxu0 %v109_v1  ;;  %v106_v5 = vld [vmem:[#allocation8 + $0x60] sm:$0xff]  ;;  %v105_v6 = vld [vmem:[#allocation8 + $0x58] sm:$0xff]  ;;  %v104_v7 = vld [vmem:[#allocation8 + $0x50] sm:$0xff]  ;;  %v1504_v19 = vshrl.u32 %v89_v18, 7 }
  0x3b   :  { %1105 = vmatpush3.xpose.msra.mxu0 %v109_v1  ;;  %v103_v8 = vld [vmem:[#allocation8 + $0x48] sm:$0xff]  ;;  %v102_v9 = vld [vmem:[#allocation8 + $0x40] sm:$0xff]  ;;  %v101_v10 = vld [vmem:[#allocation8 + $0x38] sm:$0xff] }
  0x3c   :  { %1106 = vmatprep.subr.mxu0 %v108_v2  ;;  %v100_v11 = vld [vmem:[#allocation8 + $0x30] sm:$0xff]  ;;  %v99_v12 = vld [vmem:[#allocation8 + $0x28] sm:$0xff]  ;;  %v98_v13 = vld [vmem:[#allocation8 + $0x20] sm:$0xff]  ;;  %v1507_v20 = vsub.s32 2, %v1504_v19  ;;  %v1511_v24 = vsub.s32 0, %v1504_v19  ;;  %v1517_v26 = vsub.s32 1, %v1504_v19 }
  0x3d   :  { %82 = vrot.lane.b32.xlu0 %v1500_v3, %s1439_s21  ;;  %v97_v14 = vld [vmem:[#allocation8 + $0x18] sm:$0xff]  ;;  %v96_v15 = vld [vmem:[#allocation8 + $0x10] sm:$0xff]  ;;  %v95_v16 = vld [vmem:[#allocation8 + $0x8] sm:$0xff]  ;;  %vm127_vm1 = vcmp.lt.s32.totalorder %v1504_v19, 2  ;;  %vm130_vm2 = vcmp.ge.s32.totalorder %v1504_v19, 2  ;;  %vm144_vm3 = vcmp.lt.s32.totalorder %v1504_v19, 1 }
  0x3e   :  { %v94_v17 = vld [vmem:[#allocation8] sm:$0xff]  ;;  %v1000_v36 = vld [vmem:[#allocation7] ss:$0 sm:$0xff]  ;;  %vm147_vm4 = vcmp.ge.s32.totalorder %v1504_v19, 1  ;;  %v288_v18 = vld [vmem:[#allocation8 + $0xa8] sm:$0xff]  ;;  %vm317_vm5 = vcmp.lt.s32.totalorder %v1504_v19, 4 }
  0x3f   :  { %1107 = vmatpush3.xpose.msra.mxu0 %v108_v2  ;;  %v92_v21 = vld [vmem:[#allocation5] sm:$0x7]  ;;  %vm320_vm6 = vcmp.ge.s32.totalorder %v1504_v19, 4 }
  0x40   :  { %1108 = vmatprep.subr.mxu0 %v107_v4  ;;  %v114_v23 = vrot.slane %v92_v21, %v1507_v20  ;;  %v137_v28 = vrot.slane %v92_v21, %v1511_v24  ;;  %v154_v37 = vrot.slane %v92_v21, %v1517_v26  ;;  %v287_v21 = vld [vmem:[#allocation8 + $0xa0] sm:$0xff] }
  0x43   :  { %1109 = vmatpush3.xpose.msra.mxu0 %v107_v4 }
  0x44   :  { %1110 = vmatprep.subr.mxu0 %v106_v5 }
  0x47   :  { %1111 = vmatpush3.xpose.msra.mxu0 %v106_v5 }
  0x48   :  { %1112 = vmatprep.subr.mxu0 %v105_v6 }
  0x4b   :  { %1113 = vmatpush3.xpose.msra.mxu0 %v105_v6 }
  0x4c   :  { %1114 = vmatprep.subr.mxu0 %v104_v7 }
  0x4f   :  { %1115 = vmatpush3.xpose.msra.mxu0 %v104_v7 }
  0x50   :  { %1116 = vmatprep.subr.mxu0 %v103_v8 }
  0x53   :  { %1117 = vmatpush3.xpose.msra.mxu0 %v103_v8  ;;  %v298_v8 = vld [vmem:[#allocation8 + $0xf8] sm:$0xff] }
  0x54   :  { %1118 = vmatprep.subr.mxu0 %v102_v9  ;;  %1139 = vmatprep.subr.mxu1 %v298_v8 }
  0x55   :  { %1140 = vmatpush3.xpose.msra.mxu1 %v298_v8 }
  0x57   :  { %1119 = vmatpush3.xpose.msra.mxu0 %v102_v9  ;;  %v297_v9 = vld [vmem:[#allocation8 + $0xf0] sm:$0xff] }
  0x58   :  { %1120 = vmatprep.subr.mxu0 %v101_v10  ;;  %1141 = vmatprep.subr.mxu1 %v297_v9 }
  0x59   :  { %1142 = vmatpush3.xpose.msra.mxu1 %v297_v9 }
  0x5b   :  { %1121 = vmatpush3.xpose.msra.mxu0 %v101_v10  ;;  %v296_v10 = vld [vmem:[#allocation8 + $0xe8] sm:$0xff] }
  0x5c   :  { %1122 = vmatprep.subr.mxu0 %v100_v11  ;;  %1143 = vmatprep.subr.mxu1 %v296_v10 }
  0x5d   :  { %1144 = vmatpush3.xpose.msra.mxu1 %v296_v10 }
  0x5f   :  { %1123 = vmatpush3.xpose.msra.mxu0 %v100_v11  ;;  %v295_v11 = vld [vmem:[#allocation8 + $0xe0] sm:$0xff] }
  0x60   :  { %1124 = vmatprep.subr.mxu0 %v99_v12  ;;  %1145 = vmatprep.subr.mxu1 %v295_v11 }
  0x61   :  { %1146 = vmatpush3.xpose.msra.mxu1 %v295_v11 }
  0x63   :  { %1125 = vmatpush3.xpose.msra.mxu0 %v99_v12  ;;  %v294_v12 = vld [vmem:[#allocation8 + $0xd8] sm:$0xff] }
  0x64   :  { %1126 = vmatprep.subr.mxu0 %v98_v13  ;;  %1147 = vmatprep.subr.mxu1 %v294_v12 }
  0x65   :  { %1148 = vmatpush3.xpose.msra.mxu1 %v294_v12 }
  0x67   :  { %1127 = vmatpush3.xpose.msra.mxu0 %v98_v13  ;;  %v293_v13 = vld [vmem:[#allocation8 + $0xd0] sm:$0xff] }
  0x68   :  { %1128 = vmatprep.subr.mxu0 %v97_v14  ;;  %1149 = vmatprep.subr.mxu1 %v293_v13 }
  0x69   :  { %1150 = vmatpush3.xpose.msra.mxu1 %v293_v13 }
  0x6b   :  { %1129 = vmatpush3.xpose.msra.mxu0 %v97_v14  ;;  %v292_v14 = vld [vmem:[#allocation8 + $0xc8] sm:$0xff] }
  0x6c   :  { %1130 = vmatprep.subr.mxu0 %v96_v15  ;;  %1151 = vmatprep.subr.mxu1 %v292_v14 }
  0x6d   :  { %1152 = vmatpush3.xpose.msra.mxu1 %v292_v14 }
  0x6f   :  { %1131 = vmatpush3.xpose.msra.mxu0 %v96_v15  ;;  %v291_v15 = vld [vmem:[#allocation8 + $0xc0] sm:$0xff] }
  0x70   :  { %1132 = vmatprep.subr.mxu0 %v95_v16  ;;  %1153 = vmatprep.subr.mxu1 %v291_v15 }
  0x71   :  { %1154 = vmatpush3.xpose.msra.mxu1 %v291_v15 }
  0x73   :  { %1133 = vmatpush3.xpose.msra.mxu0 %v95_v16  ;;  %v290_v16 = vld [vmem:[#allocation8 + $0xb8] sm:$0xff] }
  0x74   :  { %1134 = vmatprep.subr.mxu0 %v94_v17  ;;  %1155 = vmatprep.subr.mxu1 %v290_v16 }
  0x75   :  { %1156 = vmatpush3.xpose.msra.mxu1 %v290_v16 }
  0x77   :  { %1135 = vmatpush3.xpose.msra.mxu0 %v94_v17  ;;  %v289_v17 = vld [vmem:[#allocation8 + $0xb0] sm:$0xff] }
  0x78   :  { %1157 = vmatprep.subr.mxu1 %v289_v17 }
  0x79   :  { %1158 = vmatpush3.xpose.msra.mxu1 %v289_v17 }
  0x7a   :  { %1159 = vmatprep.subr.mxu1 %v288_v18 }
  0x7d   :  { %1160 = vmatpush3.xpose.msra.mxu1 %v288_v18 }
  0x7e   :  { %1161 = vmatprep.subr.mxu1 %v287_v21 }
  0x81   :  { %1162 = vmatpush3.xpose.msra.mxu1 %v287_v21 }
  0xab   :  { %v81_v22 = vpop.permute.xlu0 %80 }
  0xac   :  { %v1514_v25 = vsel %vm86_vm0, %v76_v0, %v81_v22  ;;  %v286_v22 = vld [vmem:[#allocation8 + $0x98] sm:$0xff] }
  0xad   :  { %v115_v29 = vmul.f32 %v114_v23, %v1514_v25  ;;  %v125_v30 = vrot.slane %v1514_v25, 6  ;;  %v142_v32 = vrot.slane %v1514_v25, 7  ;;  %1163 = vmatprep.subr.mxu1 %v286_v22 }
  0xae   :  { %1164 = vmatpush3.xpose.msra.mxu1 %v286_v22 }
  0xaf   :  { %v83_v27 = vpop.permute.xlu0 %82  ;;  %v123_v45 = vadd.f32 %v1000_v36, %v115_v29  ;;  %v1001_v29 = vld [vmem:[%s1637_s4] ss:$0 sm:$0xff] }
  0xb0   :  { %v1527_v31 = vsel %vm86_vm0, %v1500_v3, %v83_v27  ;;  %v284_v27 = vld [vmem:[#allocation8 + $0x88] sm:$0xff] }
  0xb1   :  { %v116_v33 = vmul.f32 %v114_v23, %v1527_v31  ;;  %v126_v34 = vrot.slane %v1527_v31, 6  ;;  %v143_v35 = vrot.slane %v1527_v31, 7  ;;  %v285_v23 = vld [vmem:[#allocation8 + $0x90] sm:$0xff] }
  0xb2   :  { %1165 = vmatprep.subr.mxu1 %v285_v23 }
  0xb3   :  { %v124_v38 = vadd.f32 %v1000_v36, %v116_v33  ;;  %v128_v39 = vsel %vm127_vm1, %v125_v30, %v126_v34  ;;  %v129_v40 = vsel %vm127_vm1, %v126_v34, %v125_v30  ;;  %v145_v41 = vsel %vm144_vm3, %v142_v32, %v143_v35  ;;  %1166 = vmatpush3.xpose.msra.mxu1 %v285_v23 }
  0xb4   :  { %v132_v42 = vsel %vm130_vm2, %v129_v40, 0.0  ;;  %v139_v43 = vmul.f32 %v137_v28, %v128_v39  ;;  %v146_v44 = vsel %vm144_vm3, %v143_v35, %v142_v32  ;;  %v156_v49 = vmul.f32 %v154_v37, %v145_v41  ;;  %1167 = vmatprep.subr.mxu1 %v284_v27 }
  0xb5   :  { %v138_v46 = vmul.f32 %v137_v28, %v132_v42  ;;  %v149_v47 = vsel %vm147_vm4, %v146_v44, 0.0  ;;  %v283_v28 = vld [vmem:[#allocation8 + $0x80] sm:$0xff] }
  0xb6   :  { %v141_v48 = vadd.f32 %v139_v43, %v124_v38  ;;  %v155_v51 = vmul.f32 %v154_v37, %v149_v47 }
  0xb7   :  { %v140_v50 = vadd.f32 %v138_v46, %v123_v45  ;;  %1168 = vmatpush3.xpose.msra.mxu1 %v284_v27 }
  0xb8   :  { %v158_v52 = vadd.f32 %v156_v49, %v141_v48  ;;  %1169 = vmatprep.subr.mxu1 %v283_v28  ;;  %v279_v48 = vld [vmem:[#allocation5 + $0x4] sm:$0x7] }
  0xb9   :  { %v157_v53 = vadd.f32 %v155_v51, %v140_v50 }
  0xba   :  { %v160_v54 = vmul.f32 %v158_v52, %v158_v52 }
  0xbb   :  { %v159_v55 = vmul.f32 %v157_v53, %v157_v53  ;;  %1170 = vmatpush3.xpose.msra.mxu1 %v283_v28 }
  0xbc   :  { %v162_v56 = vmul.f32 %v160_v54, %v158_v52 }
  0xbd   :  { %v161_v57 = vmul.f32 %v159_v55, %v157_v53 }
  0xbe   :  { %v164_v58 = vmul.f32 0.044715, %v162_v56 }
  0xbf   :  { %v163_v59 = vmul.f32 0.044715, %v161_v57 }
  0xc0   :  { %v166_v60 = vadd.f32 %v164_v58, %v158_v52  ;;  %v1003_v58 = vld [vmem:[#allocation7 + $0x1] ss:$0 sm:$0xff] }
  0xc1   :  { %v165_v61 = vadd.f32 %v163_v59, %v157_v53 }
  0xc2   :  { %v168_v62 = vmul.f32 0.7978846, %v166_v60  ;;  %v327_v60 = vrot.slane %v279_v48, %v1511_v24 }
  0xc3   :  { %v167_v63 = vmul.f32 0.7978846, %v165_v61 }
  0xc4   :  { %1290 = vtanh.f32 %v168_v62 }
  0xc5   :  { %1292 = vtanh.f32 %v167_v63  ;;  %v341_v63 = vrot.slane %v279_v48, %v1517_v26 }
  0xd1   :  { %v1291_v0 = vpop.eup %1290 }
  0xd2   :  { %v1293_v1 = vpop.eup %1292  ;;  %v172_v2 = vadd.f32 1.0, %v1291_v0 }
  0xd3   :  { %v171_v3 = vadd.f32 1.0, %v1293_v1 }
  0xd4   :  { %v174_v4 = vmul.f32 0.5, %v172_v2 }
  0xd5   :  { %v173_v5 = vmul.f32 0.5, %v171_v3 }
  0xd6   :  { %v176_v7 = vmul.f32 %v174_v4, %v158_v52 }
  0xd7   :  { %v175_v6 = vmul.f32 %v173_v5, %v157_v53  ;;  %v304_v53 = vrot.slane %v279_v48, %v1507_v20  ;;  %v477_v48 = vld [vmem:[#allocation8 + $0x138] sm:$0xff] }
  0xd9   :  { %1136 = vmatprep.mubr.f32.mxu0 %v175_v6 }
  0xda   :  { %1137 = vmatmul.mubr.f32.vlgmr.msra.gmra.mxu0 %v176_v7 }
 0x19a   :  { %v1138_v30 = vpop.f32.mrf.mxu0 }
 0x19b   :  { %v255_v32 = vadd.f32 %v1138_v30, %v1001_v29 }
 0x19c   :  { %v249_v33 = vpop.f32.mrf.mxu0 }
 0x19d   :  { %v259_v34 = vmul.f32 %v255_v32, %v255_v32  ;;  %v250_v35 = vadd.f32 %v1001_v29, %v249_v33 }
 0x19f   :  { %v261_v36 = vmul.f32 %v259_v34, %v255_v32  ;;  %v258_v37 = vmul.f32 %v250_v35, %v250_v35 }
 0x1a1   :  { %v263_v38 = vmul.f32 0.044715, %v261_v36  ;;  %v260_v39 = vmul.f32 %v258_v37, %v250_v35 }
 0x1a3   :  { %v265_v40 = vadd.f32 %v263_v38, %v255_v32  ;;  %v262_v41 = vmul.f32 0.044715, %v260_v39 }
 0x1a5   :  { %v267_v42 = vmul.f32 0.7978846, %v265_v40  ;;  %v264_v43 = vadd.f32 %v262_v41, %v250_v35  ;;  %v485_v40 = vld [vmem:[#allocation8 + $0x178] sm:$0xff]  ;;  %v484_v41 = vld [vmem:[#allocation8 + $0x170] sm:$0xff] }
 0x1a6   :  { %1174 = vmatprep.subr.mxu0 %v485_v40 }
 0x1a7   :  { %1294 = vtanh.f32 %v267_v42  ;;  %v266_v44 = vmul.f32 0.7978846, %v264_v43  ;;  %1175 = vmatpush3.xpose.msra.mxu0 %v485_v40  ;;  %v483_v42 = vld [vmem:[#allocation8 + $0x168] sm:$0xff]  ;;  %v482_v43 = vld [vmem:[#allocation8 + $0x160] sm:$0xff] }
 0x1a8   :  { %1176 = vmatprep.subr.mxu0 %v484_v41 }
 0x1a9   :  { %1296 = vtanh.f32 %v266_v44  ;;  %v481_v44 = vld [vmem:[#allocation8 + $0x158] sm:$0xff] }
 0x1ab   :  { %1177 = vmatpush3.xpose.msra.mxu0 %v484_v41 }
 0x1ac   :  { %1178 = vmatprep.subr.mxu0 %v483_v42 }
 0x1af   :  { %1179 = vmatpush3.xpose.msra.mxu0 %v483_v42 }
 0x1b0   :  { %1180 = vmatprep.subr.mxu0 %v482_v43 }
 0x1b3   :  { %1181 = vmatpush3.xpose.msra.mxu0 %v482_v43 }
 0x1b4   :  { %v1295_v45 = vpop.eup %1294  ;;  %1182 = vmatprep.subr.mxu0 %v481_v44 }
 0x1b5   :  { %v271_v46 = vadd.f32 1.0, %v1295_v45  ;;  %v480_v45 = vld [vmem:[#allocation8 + $0x150] sm:$0xff] }
 0x1b6   :  { %v1297_v47 = vpop.eup %1296 }
 0x1b7   :  { %v273_v49 = vmul.f32 0.5, %v271_v46  ;;  %v270_v50 = vadd.f32 1.0, %v1297_v47  ;;  %1183 = vmatpush3.xpose.msra.mxu0 %v481_v44  ;;  %v479_v46 = vld [vmem:[#allocation8 + $0x148] sm:$0xff]  ;;  %v478_v47 = vld [vmem:[#allocation8 + $0x140] sm:$0xff] }
 0x1b8   :  { %1184 = vmatprep.subr.mxu0 %v480_v45 }
 0x1b9   :  { %v275_v51 = vmul.f32 %v273_v49, %v255_v32  ;;  %v272_v52 = vmul.f32 0.5, %v270_v50  ;;  %v476_v49 = vld [vmem:[#allocation8 + $0x130] sm:$0xff]  ;;  %v475_v50 = vld [vmem:[#allocation8 + $0x128] sm:$0xff] }
 0x1bb   :  { %v1550_v54 = vadd.f32 %v275_v51, %v1527_v31  ;;  %v274_v55 = vmul.f32 %v272_v52, %v250_v35  ;;  %1185 = vmatpush3.xpose.msra.mxu0 %v480_v45  ;;  %v474_v51 = vld [vmem:[#allocation8 + $0x120] sm:$0xff]  ;;  %v473_v52 = vld [vmem:[#allocation8 + $0x118] sm:$0xff] }
 0x1bc   :  { %1186 = vmatprep.subr.mxu0 %v479_v46 }
 0x1bd   :  { %v1553_v56 = vadd.f32 %v274_v55, %v1514_v25  ;;  %v306_v57 = vmul.f32 %v304_v53, %v1550_v54  ;;  %v316_v59 = vrot.slane %v1550_v54, 4  ;;  %v333_v25 = vrot.slane %v1550_v54, 6  ;;  %v471_v55 = vld [vmem:[#allocation8 + $0x108] sm:$0xff] }
 0x1bf   :  { %v305_v61 = vmul.f32 %v304_v53, %v1553_v56  ;;  %v315_v31 = vrot.slane %v1553_v56, 4  ;;  %v332_v62 = vrot.slane %v1553_v56, 6  ;;  %v314_v0 = vadd.f32 %v1003_v58, %v306_v57  ;;  %1187 = vmatpush3.xpose.msra.mxu0 %v479_v46  ;;  %v472_v53 = vld [vmem:[#allocation8 + $0x110] sm:$0xff]  ;;  %v470_v57 = vld [vmem:[#allocation8 + $0x100] sm:$0xff] }
 0x1c0   :  { %1188 = vmatprep.subr.mxu0 %v478_v47 }
 0x1c1   :  { %v319_v1 = vsel %vm317_vm5, %v316_v59, %v315_v31  ;;  %v335_v2 = vsel %vm127_vm1, %v333_v25, %v332_v62  ;;  %v318_v3 = vsel %vm317_vm5, %v315_v31, %v316_v59  ;;  %v334_v7 = vsel %vm127_vm1, %v332_v62, %v333_v25 }
 0x1c2   :  { %v322_v4 = vsel %vm320_vm6, %v319_v1, 0.0  ;;  %v336_v5 = vsel %vm130_vm2, %v335_v2, 0.0  ;;  %v329_v6 = vmul.f32 %v327_v60, %v318_v3  ;;  %v313_v8 = vadd.f32 %v1003_v58, %v305_v61  ;;  %v1004_v58 = vld [vmem:[%s1637_s4 + $0x1] ss:$0 sm:$0xff] }
 0x1c3   :  { %v328_v9 = vmul.f32 %v327_v60, %v322_v4  ;;  %v343_v11 = vmul.f32 %v341_v63, %v334_v7  ;;  %v342_v13 = vmul.f32 %v341_v63, %v336_v5  ;;  %1189 = vmatpush3.xpose.msra.mxu0 %v478_v47 }
 0x1c4   :  { %v331_v10 = vadd.f32 %v329_v6, %v314_v0  ;;  %1190 = vmatprep.subr.mxu0 %v477_v48 }
 0x1c5   :  { %v330_v12 = vadd.f32 %v328_v9, %v313_v8 }
 0x1c6   :  { %v345_v14 = vadd.f32 %v343_v11, %v331_v10  ;;  %v466_v10 = vld [vmem:[#allocation5 + $0x8] sm:$0x7] }
 0x1c7   :  { %v344_v15 = vadd.f32 %v342_v13, %v330_v12  ;;  %1191 = vmatpush3.xpose.msra.mxu0 %v477_v48 }
 0x1c8   :  { %v347_v16 = vmul.f32 %v345_v14, %v345_v14  ;;  %1192 = vmatprep.subr.mxu0 %v476_v49 }
 0x1c9   :  { %v346_v17 = vmul.f32 %v344_v15, %v344_v15 }
 0x1ca   :  { %v349_v18 = vmul.f32 %v347_v16, %v345_v14 }
 0x1cb   :  { %v348_v21 = vmul.f32 %v346_v17, %v344_v15  ;;  %1193 = vmatpush3.xpose.msra.mxu0 %v476_v49 }
 0x1cc   :  { %v351_v22 = vmul.f32 0.044715, %v349_v18  ;;  %1194 = vmatprep.subr.mxu0 %v475_v50  ;;  %v509_v18 = vrot.slane %v466_v10, %v1511_v24 }
 0x1cd   :  { %v350_v23 = vmul.f32 0.044715, %v348_v21  ;;  %v1006_v21 = vld [vmem:[#allocation7 + $0x2] ss:$0 sm:$0xff] }
 0x1ce   :  { %v353_v27 = vadd.f32 %v351_v22, %v345_v14 }
 0x1cf   :  { %v352_v28 = vadd.f32 %v350_v23, %v344_v15  ;;  %1195 = vmatpush3.xpose.msra.mxu0 %v475_v50 }
 0x1d0   :  { %v355_v29 = vmul.f32 0.7978846, %v353_v27  ;;  %1196 = vmatprep.subr.mxu0 %v474_v51 }
 0x1d1   :  { %v354_v30 = vmul.f32 0.7978846, %v352_v28  ;;  %v510_v28 = vmul.f32 0.0, %v509_v18 }
 0x1d2   :  { %1298 = vtanh.f32 %v355_v29  ;;  %v523_v29 = vrot.slane %v466_v10, %v1517_v26 }
 0x1d3   :  { %1300 = vtanh.f32 %v354_v30  ;;  %1197 = vmatpush3.xpose.msra.mxu0 %v474_v51 }
 0x1d4   :  { %1198 = vmatprep.subr.mxu0 %v473_v52 }
 0x1d7   :  { %1199 = vmatpush3.xpose.msra.mxu0 %v473_v52 }
 0x1d8   :  { %1200 = vmatprep.subr.mxu0 %v472_v53 }
 0x1db   :  { %1201 = vmatpush3.xpose.msra.mxu0 %v472_v53 }
 0x1dc   :  { %1202 = vmatprep.subr.mxu0 %v471_v55 }
 0x1df   :  { %v1299_v32 = vpop.eup %1298  ;;  %1203 = vmatpush3.xpose.msra.mxu0 %v471_v55 }
 0x1e0   :  { %v1301_v33 = vpop.eup %1300  ;;  %v359_v34 = vadd.f32 1.0, %v1299_v32  ;;  %1204 = vmatprep.subr.mxu0 %v470_v57 }
 0x1e1   :  { %v358_v35 = vadd.f32 1.0, %v1301_v33 }
 0x1e2   :  { %v361_v36 = vmul.f32 0.5, %v359_v34 }
 0x1e3   :  { %v360_v37 = vmul.f32 0.5, %v358_v35  ;;  %1205 = vmatpush3.xpose.msra.mxu0 %v470_v57 }
 0x1e4   :  { %v363_v39 = vmul.f32 %v361_v36, %v345_v14  ;;  %v491_v14 = vrot.slane %v466_v10, %v1507_v20  ;;  %v652_v10 = vld [vmem:[#allocation8 + $0x180] sm:$0xff] }
 0x1e5   :  { %v362_v38 = vmul.f32 %v360_v37, %v344_v15 }
 0x1e7   :  { %1171 = vmatprep.mubr.f32.mxu1 %v362_v38 }
 0x1e8   :  { %1172 = vmatmul.mubr.f32.vlgmr.msra.gmra.mxu1 %v363_v39 }
 0x2a8   :  { %v1173_v59 = vpop.f32.mrf.mxu1 }
 0x2a9   :  { %v442_v60 = vadd.f32 %v1173_v59, %v1004_v58 }
 0x2aa   :  { %v436_v61 = vpop.f32.mrf.mxu1 }
 0x2ab   :  { %v446_v31 = vmul.f32 %v442_v60, %v442_v60  ;;  %v437_v62 = vadd.f32 %v1004_v58, %v436_v61  ;;  %v667_v61 = vld [vmem:[#allocation8 + $0x1f8] sm:$0xff] }
 0x2ac   :  { %1209 = vmatprep.subr.mxu1 %v667_v61 }
 0x2ad   :  { %v448_v25 = vmul.f32 %v446_v31, %v442_v60  ;;  %v445_v63 = vmul.f32 %v437_v62, %v437_v62  ;;  %1210 = vmatpush3.xpose.msra.mxu1 %v667_v61  ;;  %v666_v31 = vld [vmem:[#allocation8 + $0x1f0] sm:$0xff] }
 0x2ae   :  { %1211 = vmatprep.subr.mxu1 %v666_v31 }
 0x2af   :  { %v450_v0 = vmul.f32 0.044715, %v448_v25  ;;  %v447_v1 = vmul.f32 %v445_v63, %v437_v62  ;;  %v664_v25 = vld [vmem:[#allocation8 + $0x1e0] sm:$0xff]  ;;  %v663_v63 = vld [vmem:[#allocation8 + $0x1d8] sm:$0xff] }
 0x2b1   :  { %v452_v2 = vadd.f32 %v450_v0, %v442_v60  ;;  %v449_v3 = vmul.f32 0.044715, %v447_v1  ;;  %1212 = vmatpush3.xpose.msra.mxu1 %v666_v31  ;;  %v662_v0 = vld [vmem:[#allocation8 + $0x1d0] sm:$0xff]  ;;  %v661_v1 = vld [vmem:[#allocation8 + $0x1c8] sm:$0xff] }
 0x2b3   :  { %v454_v4 = vmul.f32 0.7978846, %v452_v2  ;;  %v451_v5 = vadd.f32 %v449_v3, %v437_v62  ;;  %v660_v2 = vld [vmem:[#allocation8 + $0x1c0] sm:$0xff]  ;;  %v659_v3 = vld [vmem:[#allocation8 + $0x1b8] sm:$0xff] }
 0x2b5   :  { %1302 = vtanh.f32 %v454_v4  ;;  %v453_v6 = vmul.f32 0.7978846, %v451_v5  ;;  %v658_v4 = vld [vmem:[#allocation8 + $0x1b0] sm:$0xff]  ;;  %v657_v5 = vld [vmem:[#allocation8 + $0x1a8] sm:$0xff] }
 0x2b7   :  { %1304 = vtanh.f32 %v453_v6  ;;  %v656_v6 = vld [vmem:[#allocation8 + $0x1a0] sm:$0xff] }
 0x2c2   :  { %v1303_v7 = vpop.eup %1302 }
 0x2c3   :  { %v458_v8 = vadd.f32 1.0, %v1303_v7  ;;  %v655_v7 = vld [vmem:[#allocation8 + $0x198] sm:$0xff] }
 0x2c4   :  { %v1305_v9 = vpop.eup %1304 }
 0x2c5   :  { %v460_v11 = vmul.f32 0.5, %v458_v8  ;;  %v457_v12 = vadd.f32 1.0, %v1305_v9  ;;  %v654_v8 = vld [vmem:[#allocation8 + $0x190] sm:$0xff]  ;;  %v653_v9 = vld [vmem:[#allocation8 + $0x188] sm:$0xff] }
 0x2c7   :  { %v462_v13 = vmul.f32 %v460_v11, %v442_v60  ;;  %v459_v15 = vmul.f32 0.5, %v457_v12  ;;  %v1007_v11 = vld [vmem:[%s1637_s4 + $0x2] ss:$0 sm:$0xff] }
 0x2c9   :  { %v1582_v16 = vadd.f32 %v462_v13, %v1550_v54  ;;  %v461_v17 = vmul.f32 %v459_v15, %v437_v62  ;;  %v665_v62 = vld [vmem:[#allocation8 + $0x1e8] sm:$0xff] }
 0x2ca   :  { %1213 = vmatprep.subr.mxu1 %v665_v62 }
 0x2cb   :  { %v493_v22 = vmul.f32 %v491_v14, %v1582_v16  ;;  %v1587_v23 = vadd.f32 %v461_v17, %v1553_v56  ;;  %v515_v27 = vrot.slane %v1582_v16, 4  ;;  %1214 = vmatpush3.xpose.msra.mxu1 %v665_v62 }
 0x2cc   :  { %1215 = vmatprep.subr.mxu1 %v664_v25 }
 0x2cd   :  { %v501_v30 = vadd.f32 %v1006_v21, %v493_v22  ;;  %v514_v32 = vrot.slane %v1587_v23, 4  ;;  %v492_v54 = vmul.f32 %v491_v14, %v1587_v23  ;;  %v511_v33 = vmul.f32 %v509_v18, %v1587_v23 }
 0x2cf   :  { %v500_v34 = vadd.f32 %v1006_v21, %v492_v54  ;;  %v517_v24 = vsel %vm317_vm5, %v515_v27, %v514_v32  ;;  %v513_v35 = vadd.f32 %v511_v33, %v501_v30  ;;  %v516_v56 = vsel %vm317_vm5, %v514_v32, %v515_v27  ;;  %1216 = vmatpush3.xpose.msra.mxu1 %v664_v25 }
 0x2d0   :  { %v518_v36 = vsel %vm320_vm6, %v517_v24, 0.0  ;;  %v525_v37 = vmul.f32 %v523_v29, %v516_v56  ;;  %1217 = vmatprep.subr.mxu1 %v663_v63 }
 0x2d1   :  { %v512_v38 = vadd.f32 %v510_v28, %v500_v34  ;;  %v524_v39 = vmul.f32 %v523_v29, %v518_v36 }
 0x2d2   :  { %v527_v40 = vadd.f32 %v525_v37, %v513_v35  ;;  %v648_v35 = vld [vmem:[#allocation5 + $0xc] sm:$0x7] }
 0x2d3   :  { %v526_v41 = vadd.f32 %v524_v39, %v512_v38  ;;  %1218 = vmatpush3.xpose.msra.mxu1 %v663_v63  ;;  %v673_v38 = vrot.slane %v648_v35, %v1507_v20 }
 0x2d4   :  { %v529_v42 = vmul.f32 %v527_v40, %v527_v40  ;;  %1219 = vmatprep.subr.mxu1 %v662_v0 }
 0x2d5   :  { %v528_v43 = vmul.f32 %v526_v41, %v526_v41 }
 0x2d6   :  { %v531_v44 = vmul.f32 %v529_v42, %v527_v40 }
 0x2d7   :  { %v530_v45 = vmul.f32 %v528_v43, %v526_v41  ;;  %1220 = vmatpush3.xpose.msra.mxu1 %v662_v0  ;;  %v1009_v43 = vld [vmem:[#allocation7 + $0x3] ss:$0 sm:$0xff] }
 0x2d8   :  { %v533_v46 = vmul.f32 0.044715, %v531_v44  ;;  %1221 = vmatprep.subr.mxu1 %v661_v1 }
 0x2d9   :  { %v532_v47 = vmul.f32 0.044715, %v530_v45 }
 0x2da   :  { %v535_v48 = vadd.f32 %v533_v46, %v527_v40 }
 0x2db   :  { %v534_v49 = vadd.f32 %v532_v47, %v526_v41  ;;  %1222 = vmatpush3.xpose.msra.mxu1 %v661_v1 }
 0x2dc   :  { %v537_v50 = vmul.f32 0.7978846, %v535_v48  ;;  %1223 = vmatprep.subr.mxu1 %v660_v2 }
 0x2dd   :  { %v536_v51 = vmul.f32 0.7978846, %v534_v49 }
 0x2de   :  { %1306 = vtanh.f32 %v537_v50 }
 0x2df   :  { %1308 = vtanh.f32 %v536_v51  ;;  %1224 = vmatpush3.xpose.msra.mxu1 %v660_v2 }
 0x2e0   :  { %1225 = vmatprep.subr.mxu1 %v659_v3 }
 0x2e3   :  { %1226 = vmatpush3.xpose.msra.mxu1 %v659_v3  ;;  %v833_v3 = vld [vmem:[#allocation8 + $0x278] sm:$0xff] }
 0x2e4   :  { %1227 = vmatprep.subr.mxu1 %v658_v4  ;;  %1244 = vmatprep.subr.mxu0 %v833_v3 }
 0x2e7   :  { %1228 = vmatpush3.xpose.msra.mxu1 %v658_v4  ;;  %v832_v4 = vld [vmem:[#allocation8 + $0x270] sm:$0xff] }
 0x2e8   :  { %1229 = vmatprep.subr.mxu1 %v657_v5 }
 0x2eb   :  { %v1307_v52 = vpop.eup %1306  ;;  %1230 = vmatpush3.xpose.msra.mxu1 %v657_v5  ;;  %v831_v5 = vld [vmem:[#allocation8 + $0x268] sm:$0xff] }
 0x2ec   :  { %v1309_v19 = vpop.eup %1308  ;;  %v541_v53 = vadd.f32 1.0, %v1307_v52  ;;  %1231 = vmatprep.subr.mxu1 %v656_v6 }
 0x2ed   :  { %v540_v55 = vadd.f32 1.0, %v1309_v19 }
 0x2ee   :  { %v543_v57 = vmul.f32 0.5, %v541_v53 }
 0x2ef   :  { %v542_v58 = vmul.f32 0.5, %v540_v55  ;;  %1232 = vmatpush3.xpose.msra.mxu1 %v656_v6  ;;  %v830_v6 = vld [vmem:[#allocation8 + $0x260] sm:$0xff] }
 0x2f0   :  { %v545_v60 = vmul.f32 %v543_v57, %v527_v40  ;;  %1233 = vmatprep.subr.mxu1 %v655_v7 }
 0x2f1   :  { %v544_v59 = vmul.f32 %v542_v58, %v526_v41  ;;  %v689_v41 = vrot.slane %v648_v35, %v1517_v26 }
 0x2f3   :  { %1206 = vmatprep.mubr.f32.mxu0 %v544_v59  ;;  %1234 = vmatpush3.xpose.msra.mxu1 %v655_v7  ;;  %v690_v49 = vmul.f32 0.0, %v689_v41  ;;  %v829_v7 = vld [vmem:[#allocation8 + $0x258] sm:$0xff] }
 0x2f4   :  { %1207 = vmatmul.mubr.f32.vlgmr.msra.gmra.mxu0 %v545_v60  ;;  %1235 = vmatprep.subr.mxu1 %v654_v8 }
 0x2f5   :  { %1245 = vmatpush3.xpose.msra.mxu0 %v833_v3 }
 0x2f6   :  { %1246 = vmatprep.subr.mxu0 %v832_v4 }
 0x2f7   :  { %1236 = vmatpush3.xpose.msra.mxu1 %v654_v8  ;;  %v828_v8 = vld [vmem:[#allocation8 + $0x250] sm:$0xff] }
 0x2f8   :  { %1237 = vmatprep.subr.mxu1 %v653_v9 }
 0x2f9   :  { %1247 = vmatpush3.xpose.msra.mxu0 %v832_v4 }
 0x2fa   :  { %1248 = vmatprep.subr.mxu0 %v831_v5 }
 0x2fb   :  { %1238 = vmatpush3.xpose.msra.mxu1 %v653_v9  ;;  %v827_v9 = vld [vmem:[#allocation8 + $0x248] sm:$0xff] }
 0x2fc   :  { %1239 = vmatprep.subr.mxu1 %v652_v10 }
 0x2fd   :  { %1249 = vmatpush3.xpose.msra.mxu0 %v831_v5  ;;  %v1013_v5 = vld [vmem:[%s1637_s4 + $0x4] ss:$0 sm:$0xff] }
 0x2fe   :  { %1250 = vmatprep.subr.mxu0 %v830_v6 }
 0x2ff   :  { %1240 = vmatpush3.xpose.msra.mxu1 %v652_v10  ;;  %v826_v10 = vld [vmem:[#allocation8 + $0x240] sm:$0xff] }
 0x301   :  { %1251 = vmatpush3.xpose.msra.mxu0 %v830_v6 }
 0x302   :  { %1252 = vmatprep.subr.mxu0 %v829_v7 }
 0x305   :  { %1253 = vmatpush3.xpose.msra.mxu0 %v829_v7 }
 0x306   :  { %1254 = vmatprep.subr.mxu0 %v828_v8 }
 0x309   :  { %1255 = vmatpush3.xpose.msra.mxu0 %v828_v8 }
 0x30a   :  { %1256 = vmatprep.subr.mxu0 %v827_v9 }
 0x30d   :  { %1257 = vmatpush3.xpose.msra.mxu0 %v827_v9 }
 0x30e   :  { %1258 = vmatprep.subr.mxu0 %v826_v10 }
 0x311   :  { %1259 = vmatpush3.xpose.msra.mxu0 %v826_v10 }
 0x3b4   :  { %v1208_v12 = vpop.f32.mrf.mxu0 }
 0x3b5   :  { %v624_v13 = vadd.f32 %v1208_v12, %v1007_v11  ;;  %v824_v12 = vld [vmem:[#allocation8 + $0x230] sm:$0xff] }
 0x3b6   :  { %v618_v14 = vpop.f32.mrf.mxu0 }
 0x3b7   :  { %v628_v15 = vmul.f32 %v624_v13, %v624_v13  ;;  %v619_v17 = vadd.f32 %v1007_v11, %v618_v14  ;;  %v825_v11 = vld [vmem:[#allocation8 + $0x238] sm:$0xff]  ;;  %v822_v14 = vld [vmem:[#allocation8 + $0x220] sm:$0xff] }
 0x3b8   :  { %1260 = vmatprep.subr.mxu0 %v825_v11 }
 0x3b9   :  { %v630_v18 = vmul.f32 %v628_v15, %v624_v13  ;;  %v627_v21 = vmul.f32 %v619_v17, %v619_v17  ;;  %1261 = vmatpush3.xpose.msra.mxu0 %v825_v11  ;;  %v821_v15 = vld [vmem:[#allocation8 + $0x218] sm:$0xff] }
 0x3ba   :  { %1262 = vmatprep.subr.mxu0 %v824_v12 }
 0x3bb   :  { %v632_v22 = vmul.f32 0.044715, %v630_v18  ;;  %v629_v27 = vmul.f32 %v627_v21, %v619_v17  ;;  %v819_v18 = vld [vmem:[#allocation8 + $0x208] sm:$0xff]  ;;  %v818_v21 = vld [vmem:[#allocation8 + $0x200] sm:$0xff] }
 0x3bd   :  { %v634_v28 = vadd.f32 %v632_v22, %v624_v13  ;;  %v631_v29 = vmul.f32 0.044715, %v629_v27  ;;  %1263 = vmatpush3.xpose.msra.mxu0 %v824_v12  ;;  %v1010_v22 = vld [vmem:[%s1637_s4 + $0x3] ss:$0 sm:$0xff]  ;;  %s1448_s4 = smov [#allocation10]  }
 0x3be   :  { %s986_s27 = sshll.u32 %s1448_s4, 4  ;;  %s987_s27 = int_to_ptr.vmem [resolvable:$true] %s986_s27 }
 0x3bf   :  { %v636_v30 = vmul.f32 0.7978846, %v634_v28  ;;  %v633_v32 = vadd.f32 %v631_v29, %v619_v17  ;;  %s1410_s30 = scalar_lea.vmem %s987_s27, 256  ;;  %p1415_p7 = scmp.lt.s32.totalorder %s987_s27, %s987_s27 }
 0x3c0   :  { %p1411_p6 = scmp.ne.s32.totalorder %s987_s27, %s1410_s30  ;;  %p1416_p8 = scmp.lt.s32.totalorder %s1410_s30, %s1410_s30 }
 0x3c1   :  { %1310 = vtanh.f32 %v636_v30  ;;  %v635_v54 = vmul.f32 0.7978846, %v633_v32 }
 0x3c2   :  { %p1417_p9 = por %p1416_p8, %p1415_p7 }
 0x3c3   :  { %1312 = vtanh.f32 %v635_v54 }
 0x3c4   :  { %p1418_p10 = pnand %p1417_p9, %p1411_p6 }
 0x3ce   :  { %v1311_v33 = vpop.eup %1310 }
 0x3cf   :  { %v640_v34 = vadd.f32 1.0, %v1311_v33 }
 0x3d0   :  { %v1313_v24 = vpop.eup %1312 }
 0x3d1   :  { %v642_v56 = vmul.f32 0.5, %v640_v34  ;;  %v639_v36 = vadd.f32 1.0, %v1313_v24 }
 0x3d3   :  { %v644_v37 = vmul.f32 %v642_v56, %v624_v13  ;;  %v641_v39 = vmul.f32 0.5, %v639_v36  ;;  %v823_v13 = vld [vmem:[#allocation8 + $0x228] sm:$0xff] }
 0x3d4   :  { %1264 = vmatprep.subr.mxu0 %v823_v13 }
 0x3d5   :  { %v1605_v40 = vadd.f32 %v644_v37, %v1582_v16  ;;  %v643_v42 = vmul.f32 %v641_v39, %v619_v17  ;;  %1265 = vmatpush3.xpose.msra.mxu0 %v823_v13  ;;  %v820_v17 = vld [vmem:[#allocation8 + $0x210] sm:$0xff] }
 0x3d6   :  { %1266 = vmatprep.subr.mxu0 %v822_v14 }
 0x3d7   :  { %v675_v44 = vmul.f32 %v673_v38, %v1605_v40  ;;  %v1610_v45 = vadd.f32 %v643_v42, %v1587_v23 }
 0x3d9   :  { %v683_v46 = vadd.f32 %v1009_v43, %v675_v44  ;;  %v674_v47 = vmul.f32 %v673_v38, %v1610_v45  ;;  %v691_v48 = vmul.f32 %v689_v41, %v1610_v45  ;;  %1267 = vmatpush3.xpose.msra.mxu0 %v822_v14 }
 0x3da   :  { %1268 = vmatprep.subr.mxu0 %v821_v15 }
 0x3db   :  { %v682_v50 = vadd.f32 %v1009_v43, %v674_v47  ;;  %v693_v51 = vadd.f32 %v691_v48, %v683_v46  ;;  %v814_v43 = vld [vmem:[#allocation5 + $0x10] sm:$0x7] }
 0x3dc   :  { %v839_v48 = vrot.slane %v814_v43, %v1507_v20 }
 0x3dd   :  { %v692_v52 = vadd.f32 %v690_v49, %v682_v50  ;;  %v695_v16 = vmul.f32 %v693_v51, %v693_v51  ;;  %1269 = vmatpush3.xpose.msra.mxu0 %v821_v15 }
 0x3de   :  { %1270 = vmatprep.subr.mxu0 %v820_v17 }
 0x3df   :  { %v694_v19 = vmul.f32 %v692_v52, %v692_v52  ;;  %v697_v53 = vmul.f32 %v695_v16, %v693_v51 }
 0x3e1   :  { %v696_v26 = vmul.f32 %v694_v19, %v692_v52  ;;  %v699_v55 = vmul.f32 0.044715, %v697_v53  ;;  %1271 = vmatpush3.xpose.msra.mxu0 %v820_v17 }
 0x3e2   :  { %1272 = vmatprep.subr.mxu0 %v819_v18 }
 0x3e3   :  { %v698_v57 = vmul.f32 0.044715, %v696_v26  ;;  %v701_v58 = vadd.f32 %v699_v55, %v693_v51 }
 0x3e5   :  { %v700_v59 = vadd.f32 %v698_v57, %v692_v52  ;;  %v703_v60 = vmul.f32 0.7978846, %v701_v58  ;;  %1273 = vmatpush3.xpose.msra.mxu0 %v819_v18 }
 0x3e6   :  { %1274 = vmatprep.subr.mxu0 %v818_v21 }
 0x3e7   :  { %v702_v23 = vmul.f32 0.7978846, %v700_v59  ;;  %1314 = vtanh.f32 %v703_v60 }
 0x3e9   :  { %1316 = vtanh.f32 %v702_v23  ;;  %1275 = vmatpush3.xpose.msra.mxu0 %v818_v21 }
 0x3f4   :  { %v1315_v61 = vpop.eup %1314 }
 0x3f5   :  { %v707_v31 = vadd.f32 1.0, %v1315_v61 }
 0x3f6   :  { %v1317_v62 = vpop.eup %1316 }
 0x3f7   :  { %v706_v25 = vadd.f32 1.0, %v1317_v62  ;;  %v709_v63 = vmul.f32 0.5, %v707_v31 }
 0x3f9   :  { %v708_v0 = vmul.f32 0.5, %v706_v25  ;;  %v711_v2 = vmul.f32 %v709_v63, %v693_v51 }
 0x3fb   :  { %v710_v1 = vmul.f32 %v708_v0, %v692_v52  ;;  %v1012_v52 = vld [vmem:[#allocation7 + $0x4] ss:$0 sm:$0xff] }
 0x3fd   :  { %1241 = vmatprep.mubr.f32.mxu1 %v710_v1 }
 0x3fe   :  { %1242 = vmatmul.mubr.f32.vlgmr.msra.gmra.mxu1 %v711_v2 }
 0x4be   :  { %v1243_v27 = vpop.f32.mrf.mxu1 }
 0x4bf   :  { %v790_v28 = vadd.f32 %v1243_v27, %v1010_v22 }
 0x4c0   :  { %v784_v29 = vpop.f32.mrf.mxu1 }
 0x4c1   :  { %v794_v30 = vmul.f32 %v790_v28, %v790_v28  ;;  %v785_v32 = vadd.f32 %v1010_v22, %v784_v29 }
 0x4c3   :  { %v796_v54 = vmul.f32 %v794_v30, %v790_v28  ;;  %v793_v33 = vmul.f32 %v785_v32, %v785_v32 }
 0x4c5   :  { %v798_v34 = vmul.f32 0.044715, %v796_v54  ;;  %v795_v24 = vmul.f32 %v793_v33, %v785_v32 }
 0x4c7   :  { %v800_v35 = vadd.f32 %v798_v34, %v790_v28  ;;  %v797_v56 = vmul.f32 0.044715, %v795_v24 }
 0x4c9   :  { %v802_v36 = vmul.f32 0.7978846, %v800_v35  ;;  %v799_v37 = vadd.f32 %v797_v56, %v785_v32 }
 0x4cb   :  { %1318 = vtanh.f32 %v802_v36  ;;  %v801_v38 = vmul.f32 0.7978846, %v799_v37 }
 0x4cd   :  { %1320 = vtanh.f32 %v801_v38 }
 0x4d8   :  { %v1319_v39 = vpop.eup %1318 }
 0x4d9   :  { %v806_v41 = vadd.f32 1.0, %v1319_v39 }
 0x4da   :  { %v1321_v42 = vpop.eup %1320 }
 0x4db   :  { %v808_v44 = vmul.f32 0.5, %v806_v41  ;;  %v805_v46 = vadd.f32 1.0, %v1321_v42 }
 0x4dd   :  { %v810_v47 = vmul.f32 %v808_v44, %v790_v28  ;;  %v807_v49 = vmul.f32 0.5, %v805_v46 }
 0x4df   :  { %v812_v50 = vadd.f32 %v810_v47, %v1605_v40  ;;  %v809_v51 = vmul.f32 %v807_v49, %v785_v32 }
 0x4e1   :  { %v841_v16 = vmul.f32 %v839_v48, %v812_v50  ;;  %v811_v19 = vadd.f32 %v809_v51, %v1610_v45 }
 0x4e3   :  { %v840_v53 = vmul.f32 %v839_v48, %v811_v19  ;;  %v849_v26 = vadd.f32 %v1012_v52, %v841_v16 }
 0x4e5   :  { %v848_v55 = vadd.f32 %v1012_v52, %v840_v53  ;;  %v851_v57 = vmul.f32 %v849_v26, %v849_v26 }
 0x4e7   :  { %v850_v58 = vmul.f32 %v848_v55, %v848_v55  ;;  %v853_v59 = vmul.f32 %v851_v57, %v849_v26 }
 0x4e9   :  { %v852_v60 = vmul.f32 %v850_v58, %v848_v55  ;;  %v855_v23 = vmul.f32 0.044715, %v853_v59 }
 0x4eb   :  { %v854_v61 = vmul.f32 0.044715, %v852_v60  ;;  %v857_v31 = vadd.f32 %v855_v23, %v849_v26 }
 0x4ed   :  { %v856_v62 = vadd.f32 %v854_v61, %v848_v55  ;;  %v859_v20 = vmul.f32 0.7978846, %v857_v31 }
 0x4ef   :  { %v858_v25 = vmul.f32 0.7978846, %v856_v62  ;;  %1322 = vtanh.f32 %v859_v20 }
 0x4f1   :  { %1324 = vtanh.f32 %v858_v25 }
 0x4fc   :  { %v1323_v40 = vpop.eup %1322 }
 0x4fd   :  { %v863_v63 = vadd.f32 1.0, %v1323_v40 }
 0x4fe   :  { %v1325_v0 = vpop.eup %1324 }
 0x4ff   :  { %v862_v1 = vadd.f32 1.0, %v1325_v0  ;;  %v865_v45 = vmul.f32 0.5, %v863_v63 }
 0x501   :  { %v864_v2 = vmul.f32 0.5, %v862_v1  ;;  %v867_v4 = vmul.f32 %v865_v45, %v849_v26 }
 0x503   :  { %v866_v3 = vmul.f32 %v864_v2, %v848_v55 }
 0x505   :  { %1276 = vmatprep.mubr.f32.mxu0 %v866_v3 }
 0x506   :  { %1277 = vmatmul.mubr.f32.vlgmr.msra.gmra.mxu0 %v867_v4 }
 0x5c6   :  { %v1278_v6 = vpop.f32.mrf.mxu0 }
 0x5c7   :  { %v946_v7 = vadd.f32 %v1278_v6, %v1013_v5 }
 0x5c8   :  { %v940_v8 = vpop.f32.mrf.mxu0 }
 0x5c9   :  { %v950_v9 = vmul.f32 %v946_v7, %v946_v7  ;;  %v941_v10 = vadd.f32 %v1013_v5, %v940_v8 }
 0x5cb   :  { %v952_v11 = vmul.f32 %v950_v9, %v946_v7  ;;  %v949_v12 = vmul.f32 %v941_v10, %v941_v10 }
 0x5cd   :  { %v954_v13 = vmul.f32 0.044715, %v952_v11  ;;  %v951_v14 = vmul.f32 %v949_v12, %v941_v10 }
 0x5cf   :  { %v956_v15 = vadd.f32 %v954_v13, %v946_v7  ;;  %v953_v17 = vmul.f32 0.044715, %v951_v14 }
 0x5d1   :  { %v958_v18 = vmul.f32 0.7978846, %v956_v15  ;;  %v955_v21 = vadd.f32 %v953_v17, %v941_v10 }
 0x5d3   :  { %v957_v22 = vmul.f32 0.7978846, %v955_v21  ;;  %1326 = vtanh.f32 %v958_v18 }
 0x5d5   :  { %1328 = vtanh.f32 %v957_v22 }
 0x5e0   :  { %v1327_v27 = vpop.eup %1326 }
 0x5e1   :  { %v962_v28 = vadd.f32 1.0, %v1327_v27 }
 0x5e2   :  { %v1329_v29 = vpop.eup %1328 }
 0x5e3   :  { %v961_v30 = vadd.f32 1.0, %v1329_v29  ;;  %v964_v54 = vmul.f32 0.5, %v962_v28 }
 0x5e5   :  { %v963_v32 = vmul.f32 0.5, %v961_v30  ;;  %v966_v24 = vmul.f32 %v964_v54, %v946_v7 }
 0x5e7   :  { %v965_v33 = vmul.f32 %v963_v32, %v941_v10  ;;  %v968_v35 = vadd.f32 %v966_v24, %v812_v50 }
 0x5e9   :  { %v967_v34 = vadd.f32 %v965_v33, %v811_v19 }
 0x5eb   :  { %971 = vrot.lane.b32.xlu1 %v967_v34, %s1439_s21 }
 0x5ef   :  { %973 = vrot.lane.b32.xlu1 %v968_v35, %s1439_s21 }
 0x65d   :  { %v972_v56 = vpop.permute.xlu1 %971 }
 0x65e   :  { %v977_v36 = vadd.f32 %v972_v56, %v967_v34 }
 0x660   :  { %979 = vst.msk [vmem:[#allocation10] sm:$0xff] %vm86_vm0, %v977_v36 }
 0x661   :  { %v974_v37 = vpop.permute.xlu1 %973 }
 0x662   :  { %v978_v38 = vadd.f32 %v974_v37, %v968_v35 }
 0x664   :  { %980 = vst.msk [vmem:[#allocation10 + $0x8] sm:$0xff] %vm86_vm0, %v978_v38 }
 0x665   :  { %1421 = shalt.err (!%p1418_p10)
}
 0x666   :  { %992 = dma.vmem_to_hbm [thread:$0]  %s987_s27, 256, %s1638_s5, [#allocation4], %s1442_s28, %s1442_s28, %s1443_s29  }
 0x667   :  { %1436 = dma.done.wait [#allocation4], 256  }
 0x668   :  { %1437 = vsyncadd [#allocation4], 4294967040 }
 0x669   :  { %996 = vsyncpa [#allocation3], 1 }
 0x66a   :  { %997 = vsyncpa [#allocation6], 1 }
 0x66b   :  { %998 = vsyncpa [#allocation9], 1 }
 0x66c   :  { %999 = vsyncpa [#allocation4], 1 }

</bundles_post_ra>
